<compile_context>
chip_gen: v5e
topology: v5e:2x2
jax: 0.10.0
libtpu: 0.0.40
codegen_flags: <defaults>
</compile_context>

<pallas_src>
import numpy as np
import jax
import jax.numpy as jnp
from jax.experimental import pallas as pl
from jax.experimental.pallas import tpu as pltpu


def _round_up(v, m):
    return ((v + m - 1) // m) * m


def _cdiv(a, b):
    return -(-a // b)


def _pad_modes(m):
    # Lane-friendly mode padding: multiple of 8 for small M, 128 once M is big.
    return _round_up(m, 128) if m >= 128 else _round_up(m, 8)


def _pick_batch_block(batch, icp, ocp, height, hp, mp,
                      target_rows=256, block_budget=32 << 20):
    """Batch block: fill the MXU M dimension (bb*Cin_p / bb*Cout_p rows) while
    keeping the pipelined blocks + scratch inside a per-core VMEM budget."""
    bb = max(1, _cdiv(target_rows, icp), _cdiv(target_rows, ocp))
    per_b = 4 * (2 * icp * height      # x block, double-buffered
                 + 2 * ocp * hp        # out block, double-buffered
                 + 2 * icp * mp        # xr / xi scratch
                 + 2 * ocp * mp)       # acc_r / acc_i scratch
    bb = min(bb, max(1, block_budget // per_b))
    return max(1, min(bb, batch))


# ------------------------------------------------------------------ kernel
def spectral_conv1d_kernel(x_ref, cr_ref, ci_ref, wr_ref, wi_ref, b_ref,
                           dr_ref, di_ref, o_ref,
                           xr_ref, xi_ref, ar_ref, ai_ref):
    # x_ref  : (bb*Cin_p, H)      batch-block of input, channels in sublanes
    # cr/ci  : (H, Mp)            truncated forward-DFT (cos / -sin), /H scaled
    # wr/wi  : (Cin_p, Cout_p, Mp) dense per-mode weights (modes in lanes)
    # b_ref  : (Cout_p, Mp)       bias folded into the DC column
    # dr/di  : (Mp, Hp)           hermitian-folded inverse DFT (lane-dense Hp)
    # o_ref  : (bb*Cout_p, Hp)
    # xr/xi  : (bb, Cin_p, Mp)    VMEM scratch (rfft output)
    # ar/ai  : (bb, Cout_p, Mp)   VMEM scratch (contraction accumulators)
    icp, ocp, mp = wr_ref.shape
    bb = ar_ref.shape[0]

    # rfft (norm='forward'): two MXU matmuls; reshape is a sublane regroup
    # (Cin_p % 8 == 0), no tile crossing.
    xr_ref[...] = jnp.dot(x_ref[...], cr_ref[...],
                          preferred_element_type=jnp.float32).reshape(bb, icp, mp)
    xi_ref[...] = jnp.dot(x_ref[...], ci_ref[...],
                          preferred_element_type=jnp.float32).reshape(bb, icp, mp)

    # Per-mode complex contraction over input channels (VPU FMAs, modes in
    # lanes).  Bias is pre-folded into the DC column of the real accumulator
    # (row 0 of Dr is all-ones over the real output samples).
    ar_ref[...] = jnp.zeros(ar_ref.shape, ar_ref.dtype) + b_ref[...]
    ai_ref[...] = jnp.zeros(ai_ref.shape, ai_ref.dtype)
    for i in range(icp):                      # static unroll; Cin_p is small
        xr_i = xr_ref[:, i:i + 1, :]          # (bb, 1, Mp)
        xi_i = xi_ref[:, i:i + 1, :]
        w_r = wr_ref[i]                       # (Cout_p, Mp)
        w_i = wi_ref[i]
        ar_ref[...] += xr_i * w_r - xi_i * w_i
        ai_ref[...] += xr_i * w_i + xi_i * w_r

    # irfft (norm='forward'): two MXU matmuls into a lane-dense (Hp) output.
    out = jnp.dot(ar_ref[...].reshape(bb * ocp, mp), dr_ref[...],
                  preferred_element_type=jnp.float32)
    out = out + jnp.dot(ai_ref[...].reshape(bb * ocp, mp), di_ref[...],
                        preferred_element_type=jnp.float32)
    o_ref[...] = out.astype(o_ref.dtype)


# ----------------------------------------------------------- host operators
def _dft_operators(height, modes, mp, hp):
    """Truncated rfft matrices Cr/Ci (H, Mp) and hermitian-folded irfft matrices
    Dr/Di (Mp, Hp), fft_norm='forward'.  Padded mode/length entries are zero."""
    n = np.arange(height)[:, None]
    k = np.arange(modes)[None, :]
    ang = 2.0 * np.pi * n * k / height
    cr = np.zeros((height, mp), np.float32)
    ci = np.zeros((height, mp), np.float32)
    cr[:, :modes] = np.cos(ang) / height
    ci[:, :modes] = -np.sin(ang) / height
    fold = np.full((modes,), 2.0)
    fold[0] = 1.0
    if height % 2 == 0 and modes == height // 2 + 1:
        fold[-1] = 1.0                                            # Nyquist
    dr = np.zeros((mp, hp), np.float32)
    di = np.zeros((mp, hp), np.float32)
    dr[:modes, :height] = fold[:, None] * np.cos(ang.T)
    di[:modes, :height] = -(fold[:, None] * np.sin(ang.T))
    return (jnp.asarray(cr), jnp.asarray(ci), jnp.asarray(dr), jnp.asarray(di))


# ---------------------------------------------------------------- wrapper
def spectral_conv1d(x, w_real, w_imag, bias=None, *,
                    target_rows=256, block_vmem_budget=32 << 20):
    """x: (B, Cin, H); w_*: (Cout, Cin, M); bias: (1, Cout, 1) -> (B, Cout, H)."""
    batch, in_ch, height = x.shape
    out_ch, _, modes = w_real.shape
    assert modes <= height // 2 + 1

    mp = _pad_modes(modes)
    hp = _round_up(height, 128)
    icp = _round_up(in_ch, 8)
    ocp = _round_up(out_ch, 8)

    cr, ci, dr, di = _dft_operators(height, modes, mp, hp)

    # Dense per-mode weights: (Cout, Cin, M) -> (Cin_p, Cout_p, Mp), zero-padded.
    wr = jnp.zeros((icp, ocp, mp), jnp.float32).at[:in_ch, :out_ch, :modes].set(
        jnp.transpose(w_real.astype(jnp.float32), (1, 0, 2)))
    wi = jnp.zeros((icp, ocp, mp), jnp.float32).at[:in_ch, :out_ch, :modes].set(
        jnp.transpose(w_imag.astype(jnp.float32), (1, 0, 2)))

    # Bias plane: bias lands in the DC column of the real accumulator.
    binit = jnp.zeros((ocp, mp), jnp.float32)
    if bias is not None:
        binit = binit.at[:out_ch, 0].set(
            jnp.reshape(bias.astype(jnp.float32), (out_ch,)))

    bb = _pick_batch_block(batch, icp, ocp, height, hp, mp,
                           target_rows, block_vmem_budget)
    b_pad = _round_up(batch, bb)
    grid = (b_pad // bb,)

    xf = x.astype(jnp.float32)
    if icp != in_ch or b_pad != batch:
        xf = jnp.pad(xf, ((0, b_pad - batch), (0, icp - in_ch), (0, 0)))
    x2d = xf.reshape(b_pad * icp, height)

    inv_bytes = 4 * (2 * height * mp + 2 * mp * hp + 2 * icp * ocp * mp + ocp * mp)
    blk_bytes = 4 * bb * (2 * icp * height + 2 * ocp * hp + 2 * icp * mp + 2 * ocp * mp)
    vmem_limit = int(min(max(int(1.4 * (inv_bytes + blk_bytes)) + (4 << 20),
                             32 << 20), 100 << 20))

    flops = (4 * b_pad * icp * height * mp        # two rfft matmuls
             + 8 * b_pad * icp * ocp * mp         # complex contraction FMAs
             + 4 * b_pad * ocp * mp * hp)         # two irfft matmuls
    bytes_accessed = 4 * (x2d.size + cr.size + ci.size + wr.size + wi.size
                          + binit.size + dr.size + di.size + b_pad * ocp * hp)

    def run(single_buffer_invariants):
        inv_kw = ({"pipeline_mode": pl.Buffered(1)}
                  if single_buffer_invariants else {})

        def inv2(shape):
            return pl.BlockSpec(shape, lambda b: (0, 0), **inv_kw)

        def inv3(shape):
            return pl.BlockSpec(shape, lambda b: (0, 0, 0), **inv_kw)

        return pl.pallas_call(
            spectral_conv1d_kernel,
            out_shape=jax.ShapeDtypeStruct((b_pad * ocp, hp), jnp.float32),
            grid_spec=pltpu.PrefetchScalarGridSpec(
                num_scalar_prefetch=0,
                grid=grid,
                in_specs=[
                    pl.BlockSpec((bb * icp, height), lambda b: (b, 0)),
                    inv2((height, mp)),           # Cr
                    inv2((height, mp)),           # Ci
                    inv3((icp, ocp, mp)),         # Wr
                    inv3((icp, ocp, mp)),         # Wi
                    inv2((ocp, mp)),              # bias plane
                    inv2((mp, hp)),               # Dr
                    inv2((mp, hp)),               # Di
                ],
                out_specs=pl.BlockSpec((bb * ocp, hp), lambda b: (b, 0)),
                scratch_shapes=[
                    pltpu.VMEM((bb, icp, mp), jnp.float32),   # xr
                    pltpu.VMEM((bb, icp, mp), jnp.float32),   # xi
                    pltpu.VMEM((bb, ocp, mp), jnp.float32),   # acc_r
                    pltpu.VMEM((bb, ocp, mp), jnp.float32),   # acc_i
                ]),
            compiler_params=pltpu.CompilerParams(
                dimension_semantics=("parallel",),
                vmem_limit_bytes=vmem_limit),
            cost_estimate=pl.CostEstimate(flops=int(flops), transcendentals=0,
                                          bytes_accessed=int(bytes_accessed)),
        )(x2d, cr, ci, wr, wi, binit, dr, di)

    try:
        out2d = run(True)          # single-buffered grid-invariant operands
    except Exception:
        out2d = run(False)         # fallback: default (double) buffering

    out = out2d.reshape(b_pad, ocp, hp)[:batch, :out_ch, :height]
    return out


# --------------------------------------------------------------- reference
def spectral_conv1d_ref(x, w_real, w_imag, bias):
    """Pure-JAX reference mirroring the PyTorch forward (fft_norm='forward')."""
    batch, in_ch, height = x.shape
    out_ch, _, modes = w_real.shape
    xh = jnp.fft.rfft(x, axis=-1, norm='forward')
    w = w_real + 1j * w_imag
    out_fft = jnp.zeros((batch, out_ch, height // 2 + 1), dtype=xh.dtype)
    out_fft = out_fft.at[:, :, :modes].set(
        jnp.einsum('bix,oix->box', xh[:, :, :modes], w))
    out = jnp.fft.irfft(out_fft, n=height, axis=-1, norm='forward')
    if bias is not None:
        out = out + bias
    return out


# TODO(synk): optional skip=True branch (PointwiseOp 1x1 conv) not implemented;
# the module default is skip=False, which this kernel covers.

if __name__ == "__main__":
    batch = 2
    in_channels = 4
    out_channels = 6
    height = 16
    modes_height = 8
    half_modes = modes_height // 2 + 1   # 5

    key = jax.random.PRNGKey(0)
    kx, kwr, kwi, kb = jax.random.split(key, 4)

    std = np.sqrt(2.0 / modes_height)
    w_real = std * jax.random.normal(kwr, (out_channels, in_channels, half_modes),
                                     dtype=jnp.float32)
    w_imag = std * jax.random.normal(kwi, (out_channels, in_channels, half_modes),
                                     dtype=jnp.float32)
    # Module init zeroes the bias; use a nonzero bias here to exercise the
    # bias-fold path of the forward (the forward accepts any bias).
    bias = 0.1 * jax.random.normal(kb, (1, out_channels, 1), dtype=jnp.float32)

    x = jax.random.normal(kx, (batch, in_channels, height), dtype=jnp.float32)

    out = spectral_conv1d(x, w_real, w_imag, bias)
    out = jax.block_until_ready(out)

    ref = spectral_conv1d_ref(x, w_real, w_imag, bias)
    assert out.shape == (batch, out_channels, height)
    assert np.allclose(np.asarray(out), np.asarray(ref), atol=1e-4, rtol=1e-4), (
        np.max(np.abs(np.asarray(out) - np.asarray(ref))))

    print("KERNEL_OK")
</pallas_src>

<mosaic_0001>
module attributes {stable_mosaic.version = 11 : i64} {
  func.func @spectral_conv1d_kernel(%arg0: i32, %arg1: memref<16x16xf32, #tpu.memory_space<vmem>>, %arg2: memref<16x8xf32, #tpu.memory_space<vmem>>, %arg3: memref<16x8xf32, #tpu.memory_space<vmem>>, %arg4: memref<8x8x8xf32, #tpu.memory_space<vmem>>, %arg5: memref<8x8x8xf32, #tpu.memory_space<vmem>>, %arg6: memref<8x8xf32, #tpu.memory_space<vmem>>, %arg7: memref<8x128xf32, #tpu.memory_space<vmem>>, %arg8: memref<8x128xf32, #tpu.memory_space<vmem>>, %arg9: memref<16x128xf32, #tpu.memory_space<vmem>>, %arg10: memref<2x8x8xf32, #tpu.memory_space<vmem>>, %arg11: memref<2x8x8xf32, #tpu.memory_space<vmem>>, %arg12: memref<2x8x8xf32, #tpu.memory_space<vmem>>, %arg13: memref<2x8x8xf32, #tpu.memory_space<vmem>>) attributes {dimension_semantics = [#tpu.dimension_semantics<parallel>], iteration_bounds = array<i64: 1>, scalar_prefetch = 0 : i64, scratch_operands = 4 : i64, tpu.core_type = #tpu.core_type<tc>, window_params = [{transform_indices = @transform_0, window_bounds = array<i64: 16, 16>}, {pipeline_mode = #tpu.pipeline_mode<synchronous>, transform_indices = @transform_1, window_bounds = array<i64: 16, 8>}, {pipeline_mode = #tpu.pipeline_mode<synchronous>, transform_indices = @transform_2, window_bounds = array<i64: 16, 8>}, {pipeline_mode = #tpu.pipeline_mode<synchronous>, transform_indices = @transform_3, window_bounds = array<i64: 8, 8, 8>}, {pipeline_mode = #tpu.pipeline_mode<synchronous>, transform_indices = @transform_4, window_bounds = array<i64: 8, 8, 8>}, {pipeline_mode = #tpu.pipeline_mode<synchronous>, transform_indices = @transform_5, window_bounds = array<i64: 8, 8>}, {pipeline_mode = #tpu.pipeline_mode<synchronous>, transform_indices = @transform_6, window_bounds = array<i64: 8, 128>}, {pipeline_mode = #tpu.pipeline_mode<synchronous>, transform_indices = @transform_7, window_bounds = array<i64: 8, 128>}, {transform_indices = @transform_8, window_bounds = array<i64: 16, 128>}]} {
    %c0 = arith.constant 0 : index
    %c0_0 = arith.constant 0 : index
    %0 = vector.load %arg1[%c0, %c0_0] : memref<16x16xf32, #tpu.memory_space<vmem>>, vector<16x16xf32>
    %c0_1 = arith.constant 0 : index
    %c0_2 = arith.constant 0 : index
    %1 = vector.load %arg2[%c0_1, %c0_2] : memref<16x8xf32, #tpu.memory_space<vmem>>, vector<16x8xf32>
    %cst = arith.constant dense<0.000000e+00> : vector<16x8xf32>
    %2 = tpu.matmul %0, %1, %cst {dimension_numbers = #tpu.dot_dimension_numbers<[1], [0], [0], [1], [0, 0, 1, 1], [], []>} : vector<16x16xf32>, vector<16x8xf32>, vector<16x8xf32> -> vector<16x8xf32>
    %3 = vector.shape_cast %2 : vector<16x8xf32> to vector<2x8x8xf32>
    %c0_3 = arith.constant 0 : index
    %c0_4 = arith.constant 0 : index
    %c0_5 = arith.constant 0 : index
    %4 = vector.load %arg10[%c0_3, %c0_4, %c0_5] : memref<2x8x8xf32, #tpu.memory_space<vmem>>, vector<2x8x8xf32>
    tpu.vector_store %arg10[%c0_3, %c0_4, %c0_5], %3 {strides = array<i32>} : memref<2x8x8xf32, #tpu.memory_space<vmem>>, vector<2x8x8xf32>,
    %c0_6 = arith.constant 0 : index
    %c0_7 = arith.constant 0 : index
    %5 = vector.load %arg1[%c0_6, %c0_7] : memref<16x16xf32, #tpu.memory_space<vmem>>, vector<16x16xf32>
    %c0_8 = arith.constant 0 : index
    %c0_9 = arith.constant 0 : index
    %6 = vector.load %arg3[%c0_8, %c0_9] : memref<16x8xf32, #tpu.memory_space<vmem>>, vector<16x8xf32>
    %cst_10 = arith.constant dense<0.000000e+00> : vector<16x8xf32>
    %7 = tpu.matmul %5, %6, %cst_10 {dimension_numbers = #tpu.dot_dimension_numbers<[1], [0], [0], [1], [0, 0, 1, 1], [], []>} : vector<16x16xf32>, vector<16x8xf32>, vector<16x8xf32> -> vector<16x8xf32>
    %8 = vector.shape_cast %7 : vector<16x8xf32> to vector<2x8x8xf32>
    %c0_11 = arith.constant 0 : index
    %c0_12 = arith.constant 0 : index
    %c0_13 = arith.constant 0 : index
    %9 = vector.load %arg11[%c0_11, %c0_12, %c0_13] : memref<2x8x8xf32, #tpu.memory_space<vmem>>, vector<2x8x8xf32>
    tpu.vector_store %arg11[%c0_11, %c0_12, %c0_13], %8 {strides = array<i32>} : memref<2x8x8xf32, #tpu.memory_space<vmem>>, vector<2x8x8xf32>,
    %cst_14 = arith.constant 0.000000e+00 : f32
    %10 = vector.broadcast %cst_14 : f32 to vector<2x8x8xf32>
    %c0_15 = arith.constant 0 : index
    %c0_16 = arith.constant 0 : index
    %11 = vector.load %arg6[%c0_15, %c0_16] : memref<8x8xf32, #tpu.memory_space<vmem>>, vector<8x8xf32>
    %12 = vector.shape_cast %11 : vector<8x8xf32> to vector<1x8x8xf32>
    %13 = vector.broadcast %12 : vector<1x8x8xf32> to vector<2x8x8xf32>
    %14 = arith.addf %10, %13 : vector<2x8x8xf32>
    %c0_17 = arith.constant 0 : index
    %c0_18 = arith.constant 0 : index
    %c0_19 = arith.constant 0 : index
    %15 = vector.load %arg12[%c0_17, %c0_18, %c0_19] : memref<2x8x8xf32, #tpu.memory_space<vmem>>, vector<2x8x8xf32>
    tpu.vector_store %arg12[%c0_17, %c0_18, %c0_19], %14 {strides = array<i32>} : memref<2x8x8xf32, #tpu.memory_space<vmem>>, vector<2x8x8xf32>,
    %cst_20 = arith.constant 0.000000e+00 : f32
    %16 = vector.broadcast %cst_20 : f32 to vector<2x8x8xf32>
    %c0_21 = arith.constant 0 : index
    %c0_22 = arith.constant 0 : index
    %c0_23 = arith.constant 0 : index
    %17 = vector.load %arg13[%c0_21, %c0_22, %c0_23] : memref<2x8x8xf32, #tpu.memory_space<vmem>>, vector<2x8x8xf32>
    tpu.vector_store %arg13[%c0_21, %c0_22, %c0_23], %16 {strides = array<i32>} : memref<2x8x8xf32, #tpu.memory_space<vmem>>, vector<2x8x8xf32>,
    %c0_24 = arith.constant 0 : index
    %c0_25 = arith.constant 0 : index
    %c0_26 = arith.constant 0 : index
    %18 = vector.load %arg10[%c0_24, %c0_25, %c0_26] : memref<2x8x8xf32, #tpu.memory_space<vmem>>, vector<2x1x8xf32>
    %c0_27 = arith.constant 0 : index
    %c0_28 = arith.constant 0 : index
    %c0_29 = arith.constant 0 : index
    %19 = vector.load %arg11[%c0_27, %c0_28, %c0_29] : memref<2x8x8xf32, #tpu.memory_space<vmem>>, vector<2x1x8xf32>
    %c0_30 = arith.constant 0 : index
    %c0_31 = arith.constant 0 : index
    %c0_32 = arith.constant 0 : index
    %20 = vector.load %arg4[%c0_30, %c0_31, %c0_32] : memref<8x8x8xf32, #tpu.memory_space<vmem>>, vector<1x8x8xf32>
    %21 = vector.shape_cast %20 : vector<1x8x8xf32> to vector<8x8xf32>
    %c0_33 = arith.constant 0 : index
    %c0_34 = arith.constant 0 : index
    %c0_35 = arith.constant 0 : index
    %22 = vector.load %arg5[%c0_33, %c0_34, %c0_35] : memref<8x8x8xf32, #tpu.memory_space<vmem>>, vector<1x8x8xf32>
    %23 = vector.shape_cast %22 : vector<1x8x8xf32> to vector<8x8xf32>
    %c0_36 = arith.constant 0 : index
    %c0_37 = arith.constant 0 : index
    %c0_38 = arith.constant 0 : index
    %24 = vector.load %arg12[%c0_36, %c0_37, %c0_38] : memref<2x8x8xf32, #tpu.memory_space<vmem>>, vector<2x8x8xf32>
    %25 = vector.shape_cast %21 : vector<8x8xf32> to vector<1x8x8xf32>
    %26 = vector.broadcast %18 : vector<2x1x8xf32> to vector<2x8x8xf32>
    %27 = vector.broadcast %25 : vector<1x8x8xf32> to vector<2x8x8xf32>
    %28 = arith.mulf %26, %27 : vector<2x8x8xf32>
    %29 = vector.shape_cast %23 : vector<8x8xf32> to vector<1x8x8xf32>
    %30 = vector.broadcast %19 : vector<2x1x8xf32> to vector<2x8x8xf32>
    %31 = vector.broadcast %29 : vector<1x8x8xf32> to vector<2x8x8xf32>
    %32 = arith.mulf %30, %31 : vector<2x8x8xf32>
    %33 = arith.subf %28, %32 : vector<2x8x8xf32>
    %34 = arith.addf %24, %33 : vector<2x8x8xf32>
    %c0_39 = arith.constant 0 : index
    %c0_40 = arith.constant 0 : index
    %c0_41 = arith.constant 0 : index
    %35 = vector.load %arg12[%c0_39, %c0_40, %c0_41] : memref<2x8x8xf32, #tpu.memory_space<vmem>>, vector<2x8x8xf32>
    tpu.vector_store %arg12[%c0_39, %c0_40, %c0_41], %34 {strides = array<i32>} : memref<2x8x8xf32, #tpu.memory_space<vmem>>, vector<2x8x8xf32>,
    %c0_42 = arith.constant 0 : index
    %c0_43 = arith.constant 0 : index
    %c0_44 = arith.constant 0 : index
    %36 = vector.load %arg13[%c0_42, %c0_43, %c0_44] : memref<2x8x8xf32, #tpu.memory_space<vmem>>, vector<2x8x8xf32>
    %37 = vector.shape_cast %23 : vector<8x8xf32> to vector<1x8x8xf32>
    %38 = vector.broadcast %18 : vector<2x1x8xf32> to vector<2x8x8xf32>
    %39 = vector.broadcast %37 : vector<1x8x8xf32> to vector<2x8x8xf32>
    %40 = arith.mulf %38, %39 : vector<2x8x8xf32>
    %41 = vector.shape_cast %21 : vector<8x8xf32> to vector<1x8x8xf32>
    %42 = vector.broadcast %19 : vector<2x1x8xf32> to vector<2x8x8xf32>
    %43 = vector.broadcast %41 : vector<1x8x8xf32> to vector<2x8x8xf32>
    %44 = arith.mulf %42, %43 : vector<2x8x8xf32>
    %45 = arith.addf %40, %44 : vector<2x8x8xf32>
    %46 = arith.addf %36, %45 : vector<2x8x8xf32>
    %c0_45 = arith.constant 0 : index
    %c0_46 = arith.constant 0 : index
    %c0_47 = arith.constant 0 : index
    %47 = vector.load %arg13[%c0_45, %c0_46, %c0_47] : memref<2x8x8xf32, #tpu.memory_space<vmem>>, vector<2x8x8xf32>
    tpu.vector_store %arg13[%c0_45, %c0_46, %c0_47], %46 {strides = array<i32>} : memref<2x8x8xf32, #tpu.memory_space<vmem>>, vector<2x8x8xf32>,
    %c0_48 = arith.constant 0 : index
    %c1 = arith.constant 1 : index
    %c0_49 = arith.constant 0 : index
    %48 = vector.load %arg10[%c0_48, %c1, %c0_49] : memref<2x8x8xf32, #tpu.memory_space<vmem>>, vector<2x1x8xf32>
    %c0_50 = arith.constant 0 : index
    %c1_51 = arith.constant 1 : index
    %c0_52 = arith.constant 0 : index
    %49 = vector.load %arg11[%c0_50, %c1_51, %c0_52] : memref<2x8x8xf32, #tpu.memory_space<vmem>>, vector<2x1x8xf32>
    %c1_53 = arith.constant 1 : index
    %c0_54 = arith.constant 0 : index
    %c0_55 = arith.constant 0 : index
    %50 = vector.load %arg4[%c1_53, %c0_54, %c0_55] : memref<8x8x8xf32, #tpu.memory_space<vmem>>, vector<1x8x8xf32>
    %51 = vector.shape_cast %50 : vector<1x8x8xf32> to vector<8x8xf32>
    %c1_56 = arith.constant 1 : index
    %c0_57 = arith.constant 0 : index
    %c0_58 = arith.constant 0 : index
    %52 = vector.load %arg5[%c1_56, %c0_57, %c0_58] : memref<8x8x8xf32, #tpu.memory_space<vmem>>, vector<1x8x8xf32>
    %53 = vector.shape_cast %52 : vector<1x8x8xf32> to vector<8x8xf32>
    %c0_59 = arith.constant 0 : index
    %c0_60 = arith.constant 0 : index
    %c0_61 = arith.constant 0 : index
    %54 = vector.load %arg12[%c0_59, %c0_60, %c0_61] : memref<2x8x8xf32, #tpu.memory_space<vmem>>, vector<2x8x8xf32>
    %55 = vector.shape_cast %51 : vector<8x8xf32> to vector<1x8x8xf32>
    %56 = vector.broadcast %48 : vector<2x1x8xf32> to vector<2x8x8xf32>
    %57 = vector.broadcast %55 : vector<1x8x8xf32> to vector<2x8x8xf32>
    %58 = arith.mulf %56, %57 : vector<2x8x8xf32>
    %59 = vector.shape_cast %53 : vector<8x8xf32> to vector<1x8x8xf32>
    %60 = vector.broadcast %49 : vector<2x1x8xf32> to vector<2x8x8xf32>
    %61 = vector.broadcast %59 : vector<1x8x8xf32> to vector<2x8x8xf32>
    %62 = arith.mulf %60, %61 : vector<2x8x8xf32>
    %63 = arith.subf %58, %62 : vector<2x8x8xf32>
    %64 = arith.addf %54, %63 : vector<2x8x8xf32>
    %c0_62 = arith.constant 0 : index
    %c0_63 = arith.constant 0 : index
    %c0_64 = arith.constant 0 : index
    %65 = vector.load %arg12[%c0_62, %c0_63, %c0_64] : memref<2x8x8xf32, #tpu.memory_space<vmem>>, vector<2x8x8xf32>
    tpu.vector_store %arg12[%c0_62, %c0_63, %c0_64], %64 {strides = array<i32>} : memref<2x8x8xf32, #tpu.memory_space<vmem>>, vector<2x8x8xf32>,
    %c0_65 = arith.constant 0 : index
    %c0_66 = arith.constant 0 : index
    %c0_67 = arith.constant 0 : index
    %66 = vector.load %arg13[%c0_65, %c0_66, %c0_67] : memref<2x8x8xf32, #tpu.memory_space<vmem>>, vector<2x8x8xf32>
    %67 = vector.shape_cast %53 : vector<8x8xf32> to vector<1x8x8xf32>
    %68 = vector.broadcast %48 : vector<2x1x8xf32> to vector<2x8x8xf32>
    %69 = vector.broadcast %67 : vector<1x8x8xf32> to vector<2x8x8xf32>
    %70 = arith.mulf %68, %69 : vector<2x8x8xf32>
    %71 = vector.shape_cast %51 : vector<8x8xf32> to vector<1x8x8xf32>
    %72 = vector.broadcast %49 : vector<2x1x8xf32> to vector<2x8x8xf32>
    %73 = vector.broadcast %71 : vector<1x8x8xf32> to vector<2x8x8xf32>
    %74 = arith.mulf %72, %73 : vector<2x8x8xf32>
    %75 = arith.addf %70, %74 : vector<2x8x8xf32>
    %76 = arith.addf %66, %75 : vector<2x8x8xf32>
    %c0_68 = arith.constant 0 : index
    %c0_69 = arith.constant 0 : index
    %c0_70 = arith.constant 0 : index
    %77 = vector.load %arg13[%c0_68, %c0_69, %c0_70] : memref<2x8x8xf32, #tpu.memory_space<vmem>>, vector<2x8x8xf32>
    tpu.vector_store %arg13[%c0_68, %c0_69, %c0_70], %76 {strides = array<i32>} : memref<2x8x8xf32, #tpu.memory_space<vmem>>, vector<2x8x8xf32>,
    %c0_71 = arith.constant 0 : index
    %c2 = arith.constant 2 : index
    %c0_72 = arith.constant 0 : index
    %78 = vector.load %arg10[%c0_71, %c2, %c0_72] : memref<2x8x8xf32, #tpu.memory_space<vmem>>, vector<2x1x8xf32>
    %c0_73 = arith.constant 0 : index
    %c2_74 = arith.constant 2 : index
    %c0_75 = arith.constant 0 : index
    %79 = vector.load %arg11[%c0_73, %c2_74, %c0_75] : memref<2x8x8xf32, #tpu.memory_space<vmem>>, vector<2x1x8xf32>
    %c2_76 = arith.constant 2 : index
    %c0_77 = arith.constant 0 : index
    %c0_78 = arith.constant 0 : index
    %80 = vector.load %arg4[%c2_76, %c0_77, %c0_78] : memref<8x8x8xf32, #tpu.memory_space<vmem>>, vector<1x8x8xf32>
    %81 = vector.shape_cast %80 : vector<1x8x8xf32> to vector<8x8xf32>
    %c2_79 = arith.constant 2 : index
    %c0_80 = arith.constant 0 : index
    %c0_81 = arith.constant 0 : index
    %82 = vector.load %arg5[%c2_79, %c0_80, %c0_81] : memref<8x8x8xf32, #tpu.memory_space<vmem>>, vector<1x8x8xf32>
    %83 = vector.shape_cast %82 : vector<1x8x8xf32> to vector<8x8xf32>
    %c0_82 = arith.constant 0 : index
    %c0_83 = arith.constant 0 : index
    %c0_84 = arith.constant 0 : index
    %84 = vector.load %arg12[%c0_82, %c0_83, %c0_84] : memref<2x8x8xf32, #tpu.memory_space<vmem>>, vector<2x8x8xf32>
    %85 = vector.shape_cast %81 : vector<8x8xf32> to vector<1x8x8xf32>
    %86 = vector.broadcast %78 : vector<2x1x8xf32> to vector<2x8x8xf32>
    %87 = vector.broadcast %85 : vector<1x8x8xf32> to vector<2x8x8xf32>
    %88 = arith.mulf %86, %87 : vector<2x8x8xf32>
    %89 = vector.shape_cast %83 : vector<8x8xf32> to vector<1x8x8xf32>
    %90 = vector.broadcast %79 : vector<2x1x8xf32> to vector<2x8x8xf32>
    %91 = vector.broadcast %89 : vector<1x8x8xf32> to vector<2x8x8xf32>
    %92 = arith.mulf %90, %91 : vector<2x8x8xf32>
    %93 = arith.subf %88, %92 : vector<2x8x8xf32>
    %94 = arith.addf %84, %93 : vector<2x8x8xf32>
    %c0_85 = arith.constant 0 : index
    %c0_86 = arith.constant 0 : index
    %c0_87 = arith.constant 0 : index
    %95 = vector.load %arg12[%c0_85, %c0_86, %c0_87] : memref<2x8x8xf32, #tpu.memory_space<vmem>>, vector<2x8x8xf32>
    tpu.vector_store %arg12[%c0_85, %c0_86, %c0_87], %94 {strides = array<i32>} : memref<2x8x8xf32, #tpu.memory_space<vmem>>, vector<2x8x8xf32>,
    %c0_88 = arith.constant 0 : index
    %c0_89 = arith.constant 0 : index
    %c0_90 = arith.constant 0 : index
    %96 = vector.load %arg13[%c0_88, %c0_89, %c0_90] : memref<2x8x8xf32, #tpu.memory_space<vmem>>, vector<2x8x8xf32>
    %97 = vector.shape_cast %83 : vector<8x8xf32> to vector<1x8x8xf32>
    %98 = vector.broadcast %78 : vector<2x1x8xf32> to vector<2x8x8xf32>
    %99 = vector.broadcast %97 : vector<1x8x8xf32> to vector<2x8x8xf32>
    %100 = arith.mulf %98, %99 : vector<2x8x8xf32>
    %101 = vector.shape_cast %81 : vector<8x8xf32> to vector<1x8x8xf32>
    %102 = vector.broadcast %79 : vector<2x1x8xf32> to vector<2x8x8xf32>
    %103 = vector.broadcast %101 : vector<1x8x8xf32> to vector<2x8x8xf32>
    %104 = arith.mulf %102, %103 : vector<2x8x8xf32>
    %105 = arith.addf %100, %104 : vector<2x8x8xf32>
    %106 = arith.addf %96, %105 : vector<2x8x8xf32>
    %c0_91 = arith.constant 0 : index
    %c0_92 = arith.constant 0 : index
    %c0_93 = arith.constant 0 : index
    %107 = vector.load %arg13[%c0_91, %c0_92, %c0_93] : memref<2x8x8xf32, #tpu.memory_space<vmem>>, vector<2x8x8xf32>
    tpu.vector_store %arg13[%c0_91, %c0_92, %c0_93], %106 {strides = array<i32>} : memref<2x8x8xf32, #tpu.memory_space<vmem>>, vector<2x8x8xf32>,
    %c0_94 = arith.constant 0 : index
    %c3 = arith.constant 3 : index
    %c0_95 = arith.constant 0 : index
    %108 = vector.load %arg10[%c0_94, %c3, %c0_95] : memref<2x8x8xf32, #tpu.memory_space<vmem>>, vector<2x1x8xf32>
    %c0_96 = arith.constant 0 : index
    %c3_97 = arith.constant 3 : index
    %c0_98 = arith.constant 0 : index
    %109 = vector.load %arg11[%c0_96, %c3_97, %c0_98] : memref<2x8x8xf32, #tpu.memory_space<vmem>>, vector<2x1x8xf32>
    %c3_99 = arith.constant 3 : index
    %c0_100 = arith.constant 0 : index
    %c0_101 = arith.constant 0 : index
    %110 = vector.load %arg4[%c3_99, %c0_100, %c0_101] : memref<8x8x8xf32, #tpu.memory_space<vmem>>, vector<1x8x8xf32>
    %111 = vector.shape_cast %110 : vector<1x8x8xf32> to vector<8x8xf32>
    %c3_102 = arith.constant 3 : index
    %c0_103 = arith.constant 0 : index
    %c0_104 = arith.constant 0 : index
    %112 = vector.load %arg5[%c3_102, %c0_103, %c0_104] : memref<8x8x8xf32, #tpu.memory_space<vmem>>, vector<1x8x8xf32>
    %113 = vector.shape_cast %112 : vector<1x8x8xf32> to vector<8x8xf32>
    %c0_105 = arith.constant 0 : index
    %c0_106 = arith.constant 0 : index
    %c0_107 = arith.constant 0 : index
    %114 = vector.load %arg12[%c0_105, %c0_106, %c0_107] : memref<2x8x8xf32, #tpu.memory_space<vmem>>, vector<2x8x8xf32>
    %115 = vector.shape_cast %111 : vector<8x8xf32> to vector<1x8x8xf32>
    %116 = vector.broadcast %108 : vector<2x1x8xf32> to vector<2x8x8xf32>
    %117 = vector.broadcast %115 : vector<1x8x8xf32> to vector<2x8x8xf32>
    %118 = arith.mulf %116, %117 : vector<2x8x8xf32>
    %119 = vector.shape_cast %113 : vector<8x8xf32> to vector<1x8x8xf32>
    %120 = vector.broadcast %109 : vector<2x1x8xf32> to vector<2x8x8xf32>
    %121 = vector.broadcast %119 : vector<1x8x8xf32> to vector<2x8x8xf32>
    %122 = arith.mulf %120, %121 : vector<2x8x8xf32>
    %123 = arith.subf %118, %122 : vector<2x8x8xf32>
    %124 = arith.addf %114, %123 : vector<2x8x8xf32>
    %c0_108 = arith.constant 0 : index
    %c0_109 = arith.constant 0 : index
    %c0_110 = arith.constant 0 : index
    %125 = vector.load %arg12[%c0_108, %c0_109, %c0_110] : memref<2x8x8xf32, #tpu.memory_space<vmem>>, vector<2x8x8xf32>
    tpu.vector_store %arg12[%c0_108, %c0_109, %c0_110], %124 {strides = array<i32>} : memref<2x8x8xf32, #tpu.memory_space<vmem>>, vector<2x8x8xf32>,
    %c0_111 = arith.constant 0 : index
    %c0_112 = arith.constant 0 : index
    %c0_113 = arith.constant 0 : index
    %126 = vector.load %arg13[%c0_111, %c0_112, %c0_113] : memref<2x8x8xf32, #tpu.memory_space<vmem>>, vector<2x8x8xf32>
    %127 = vector.shape_cast %113 : vector<8x8xf32> to vector<1x8x8xf32>
    %128 = vector.broadcast %108 : vector<2x1x8xf32> to vector<2x8x8xf32>
    %129 = vector.broadcast %127 : vector<1x8x8xf32> to vector<2x8x8xf32>
    %130 = arith.mulf %128, %129 : vector<2x8x8xf32>
    %131 = vector.shape_cast %111 : vector<8x8xf32> to vector<1x8x8xf32>
    %132 = vector.broadcast %109 : vector<2x1x8xf32> to vector<2x8x8xf32>
    %133 = vector.broadcast %131 : vector<1x8x8xf32> to vector<2x8x8xf32>
    %134 = arith.mulf %132, %133 : vector<2x8x8xf32>
    %135 = arith.addf %130, %134 : vector<2x8x8xf32>
    %136 = arith.addf %126, %135 : vector<2x8x8xf32>
    %c0_114 = arith.constant 0 : index
    %c0_115 = arith.constant 0 : index
    %c0_116 = arith.constant 0 : index
    %137 = vector.load %arg13[%c0_114, %c0_115, %c0_116] : memref<2x8x8xf32, #tpu.memory_space<vmem>>, vector<2x8x8xf32>
    tpu.vector_store %arg13[%c0_114, %c0_115, %c0_116], %136 {strides = array<i32>} : memref<2x8x8xf32, #tpu.memory_space<vmem>>, vector<2x8x8xf32>,
    %c0_117 = arith.constant 0 : index
    %c4 = arith.constant 4 : index
    %c0_118 = arith.constant 0 : index
    %138 = vector.load %arg10[%c0_117, %c4, %c0_118] : memref<2x8x8xf32, #tpu.memory_space<vmem>>, vector<2x1x8xf32>
    %c0_119 = arith.constant 0 : index
    %c4_120 = arith.constant 4 : index
    %c0_121 = arith.constant 0 : index
    %139 = vector.load %arg11[%c0_119, %c4_120, %c0_121] : memref<2x8x8xf32, #tpu.memory_space<vmem>>, vector<2x1x8xf32>
    %c4_122 = arith.constant 4 : index
    %c0_123 = arith.constant 0 : index
    %c0_124 = arith.constant 0 : index
    %140 = vector.load %arg4[%c4_122, %c0_123, %c0_124] : memref<8x8x8xf32, #tpu.memory_space<vmem>>, vector<1x8x8xf32>
    %141 = vector.shape_cast %140 : vector<1x8x8xf32> to vector<8x8xf32>
    %c4_125 = arith.constant 4 : index
    %c0_126 = arith.constant 0 : index
    %c0_127 = arith.constant 0 : index
    %142 = vector.load %arg5[%c4_125, %c0_126, %c0_127] : memref<8x8x8xf32, #tpu.memory_space<vmem>>, vector<1x8x8xf32>
    %143 = vector.shape_cast %142 : vector<1x8x8xf32> to vector<8x8xf32>
    %c0_128 = arith.constant 0 : index
    %c0_129 = arith.constant 0 : index
    %c0_130 = arith.constant 0 : index
    %144 = vector.load %arg12[%c0_128, %c0_129, %c0_130] : memref<2x8x8xf32, #tpu.memory_space<vmem>>, vector<2x8x8xf32>
    %145 = vector.shape_cast %141 : vector<8x8xf32> to vector<1x8x8xf32>
    %146 = vector.broadcast %138 : vector<2x1x8xf32> to vector<2x8x8xf32>
    %147 = vector.broadcast %145 : vector<1x8x8xf32> to vector<2x8x8xf32>
    %148 = arith.mulf %146, %147 : vector<2x8x8xf32>
    %149 = vector.shape_cast %143 : vector<8x8xf32> to vector<1x8x8xf32>
    %150 = vector.broadcast %139 : vector<2x1x8xf32> to vector<2x8x8xf32>
    %151 = vector.broadcast %149 : vector<1x8x8xf32> to vector<2x8x8xf32>
    %152 = arith.mulf %150, %151 : vector<2x8x8xf32>
    %153 = arith.subf %148, %152 : vector<2x8x8xf32>
    %154 = arith.addf %144, %153 : vector<2x8x8xf32>
    %c0_131 = arith.constant 0 : index
    %c0_132 = arith.constant 0 : index
    %c0_133 = arith.constant 0 : index
    %155 = vector.load %arg12[%c0_131, %c0_132, %c0_133] : memref<2x8x8xf32, #tpu.memory_space<vmem>>, vector<2x8x8xf32>
    tpu.vector_store %arg12[%c0_131, %c0_132, %c0_133], %154 {strides = array<i32>} : memref<2x8x8xf32, #tpu.memory_space<vmem>>, vector<2x8x8xf32>,
    %c0_134 = arith.constant 0 : index
    %c0_135 = arith.constant 0 : index
    %c0_136 = arith.constant 0 : index
    %156 = vector.load %arg13[%c0_134, %c0_135, %c0_136] : memref<2x8x8xf32, #tpu.memory_space<vmem>>, vector<2x8x8xf32>
    %157 = vector.shape_cast %143 : vector<8x8xf32> to vector<1x8x8xf32>
    %158 = vector.broadcast %138 : vector<2x1x8xf32> to vector<2x8x8xf32>
    %159 = vector.broadcast %157 : vector<1x8x8xf32> to vector<2x8x8xf32>
    %160 = arith.mulf %158, %159 : vector<2x8x8xf32>
    %161 = vector.shape_cast %141 : vector<8x8xf32> to vector<1x8x8xf32>
    %162 = vector.broadcast %139 : vector<2x1x8xf32> to vector<2x8x8xf32>
    %163 = vector.broadcast %161 : vector<1x8x8xf32> to vector<2x8x8xf32>
    %164 = arith.mulf %162, %163 : vector<2x8x8xf32>
    %165 = arith.addf %160, %164 : vector<2x8x8xf32>
    %166 = arith.addf %156, %165 : vector<2x8x8xf32>
    %c0_137 = arith.constant 0 : index
    %c0_138 = arith.constant 0 : index
    %c0_139 = arith.constant 0 : index
    %167 = vector.load %arg13[%c0_137, %c0_138, %c0_139] : memref<2x8x8xf32, #tpu.memory_space<vmem>>, vector<2x8x8xf32>
    tpu.vector_store %arg13[%c0_137, %c0_138, %c0_139], %166 {strides = array<i32>} : memref<2x8x8xf32, #tpu.memory_space<vmem>>, vector<2x8x8xf32>,
    %c0_140 = arith.constant 0 : index
    %c5 = arith.constant 5 : index
    %c0_141 = arith.constant 0 : index
    %168 = vector.load %arg10[%c0_140, %c5, %c0_141] : memref<2x8x8xf32, #tpu.memory_space<vmem>>, vector<2x1x8xf32>
    %c0_142 = arith.constant 0 : index
    %c5_143 = arith.constant 5 : index
    %c0_144 = arith.constant 0 : index
    %169 = vector.load %arg11[%c0_142, %c5_143, %c0_144] : memref<2x8x8xf32, #tpu.memory_space<vmem>>, vector<2x1x8xf32>
    %c5_145 = arith.constant 5 : index
    %c0_146 = arith.constant 0 : index
    %c0_147 = arith.constant 0 : index
    %170 = vector.load %arg4[%c5_145, %c0_146, %c0_147] : memref<8x8x8xf32, #tpu.memory_space<vmem>>, vector<1x8x8xf32>
    %171 = vector.shape_cast %170 : vector<1x8x8xf32> to vector<8x8xf32>
    %c5_148 = arith.constant 5 : index
    %c0_149 = arith.constant 0 : index
    %c0_150 = arith.constant 0 : index
    %172 = vector.load %arg5[%c5_148, %c0_149, %c0_150] : memref<8x8x8xf32, #tpu.memory_space<vmem>>, vector<1x8x8xf32>
    %173 = vector.shape_cast %172 : vector<1x8x8xf32> to vector<8x8xf32>
    %c0_151 = arith.constant 0 : index
    %c0_152 = arith.constant 0 : index
    %c0_153 = arith.constant 0 : index
    %174 = vector.load %arg12[%c0_151, %c0_152, %c0_153] : memref<2x8x8xf32, #tpu.memory_space<vmem>>, vector<2x8x8xf32>
    %175 = vector.shape_cast %171 : vector<8x8xf32> to vector<1x8x8xf32>
    %176 = vector.broadcast %168 : vector<2x1x8xf32> to vector<2x8x8xf32>
    %177 = vector.broadcast %175 : vector<1x8x8xf32> to vector<2x8x8xf32>
    %178 = arith.mulf %176, %177 : vector<2x8x8xf32>
    %179 = vector.shape_cast %173 : vector<8x8xf32> to vector<1x8x8xf32>
    %180 = vector.broadcast %169 : vector<2x1x8xf32> to vector<2x8x8xf32>
    %181 = vector.broadcast %179 : vector<1x8x8xf32> to vector<2x8x8xf32>
    %182 = arith.mulf %180, %181 : vector<2x8x8xf32>
    %183 = arith.subf %178, %182 : vector<2x8x8xf32>
    %184 = arith.addf %174, %183 : vector<2x8x8xf32>
    %c0_154 = arith.constant 0 : index
    %c0_155 = arith.constant 0 : index
    %c0_156 = arith.constant 0 : index
    %185 = vector.load %arg12[%c0_154, %c0_155, %c0_156] : memref<2x8x8xf32, #tpu.memory_space<vmem>>, vector<2x8x8xf32>
    tpu.vector_store %arg12[%c0_154, %c0_155, %c0_156], %184 {strides = array<i32>} : memref<2x8x8xf32, #tpu.memory_space<vmem>>, vector<2x8x8xf32>,
    %c0_157 = arith.constant 0 : index
    %c0_158 = arith.constant 0 : index
    %c0_159 = arith.constant 0 : index
    %186 = vector.load %arg13[%c0_157, %c0_158, %c0_159] : memref<2x8x8xf32, #tpu.memory_space<vmem>>, vector<2x8x8xf32>
    %187 = vector.shape_cast %173 : vector<8x8xf32> to vector<1x8x8xf32>
    %188 = vector.broadcast %168 : vector<2x1x8xf32> to vector<2x8x8xf32>
    %189 = vector.broadcast %187 : vector<1x8x8xf32> to vector<2x8x8xf32>
    %190 = arith.mulf %188, %189 : vector<2x8x8xf32>
    %191 = vector.shape_cast %171 : vector<8x8xf32> to vector<1x8x8xf32>
    %192 = vector.broadcast %169 : vector<2x1x8xf32> to vector<2x8x8xf32>
    %193 = vector.broadcast %191 : vector<1x8x8xf32> to vector<2x8x8xf32>
    %194 = arith.mulf %192, %193 : vector<2x8x8xf32>
    %195 = arith.addf %190, %194 : vector<2x8x8xf32>
    %196 = arith.addf %186, %195 : vector<2x8x8xf32>
    %c0_160 = arith.constant 0 : index
    %c0_161 = arith.constant 0 : index
    %c0_162 = arith.constant 0 : index
    %197 = vector.load %arg13[%c0_160, %c0_161, %c0_162] : memref<2x8x8xf32, #tpu.memory_space<vmem>>, vector<2x8x8xf32>
    tpu.vector_store %arg13[%c0_160, %c0_161, %c0_162], %196 {strides = array<i32>} : memref<2x8x8xf32, #tpu.memory_space<vmem>>, vector<2x8x8xf32>,
    %c0_163 = arith.constant 0 : index
    %c6 = arith.constant 6 : index
    %c0_164 = arith.constant 0 : index
    %198 = vector.load %arg10[%c0_163, %c6, %c0_164] : memref<2x8x8xf32, #tpu.memory_space<vmem>>, vector<2x1x8xf32>
    %c0_165 = arith.constant 0 : index
    %c6_166 = arith.constant 6 : index
    %c0_167 = arith.constant 0 : index
    %199 = vector.load %arg11[%c0_165, %c6_166, %c0_167] : memref<2x8x8xf32, #tpu.memory_space<vmem>>, vector<2x1x8xf32>
    %c6_168 = arith.constant 6 : index
    %c0_169 = arith.constant 0 : index
    %c0_170 = arith.constant 0 : index
    %200 = vector.load %arg4[%c6_168, %c0_169, %c0_170] : memref<8x8x8xf32, #tpu.memory_space<vmem>>, vector<1x8x8xf32>
    %201 = vector.shape_cast %200 : vector<1x8x8xf32> to vector<8x8xf32>
    %c6_171 = arith.constant 6 : index
    %c0_172 = arith.constant 0 : index
    %c0_173 = arith.constant 0 : index
    %202 = vector.load %arg5[%c6_171, %c0_172, %c0_173] : memref<8x8x8xf32, #tpu.memory_space<vmem>>, vector<1x8x8xf32>
    %203 = vector.shape_cast %202 : vector<1x8x8xf32> to vector<8x8xf32>
    %c0_174 = arith.constant 0 : index
    %c0_175 = arith.constant 0 : index
    %c0_176 = arith.constant 0 : index
    %204 = vector.load %arg12[%c0_174, %c0_175, %c0_176] : memref<2x8x8xf32, #tpu.memory_space<vmem>>, vector<2x8x8xf32>
    %205 = vector.shape_cast %201 : vector<8x8xf32> to vector<1x8x8xf32>
    %206 = vector.broadcast %198 : vector<2x1x8xf32> to vector<2x8x8xf32>
    %207 = vector.broadcast %205 : vector<1x8x8xf32> to vector<2x8x8xf32>
    %208 = arith.mulf %206, %207 : vector<2x8x8xf32>
    %209 = vector.shape_cast %203 : vector<8x8xf32> to vector<1x8x8xf32>
    %210 = vector.broadcast %199 : vector<2x1x8xf32> to vector<2x8x8xf32>
    %211 = vector.broadcast %209 : vector<1x8x8xf32> to vector<2x8x8xf32>
    %212 = arith.mulf %210, %211 : vector<2x8x8xf32>
    %213 = arith.subf %208, %212 : vector<2x8x8xf32>
    %214 = arith.addf %204, %213 : vector<2x8x8xf32>
    %c0_177 = arith.constant 0 : index
    %c0_178 = arith.constant 0 : index
    %c0_179 = arith.constant 0 : index
    %215 = vector.load %arg12[%c0_177, %c0_178, %c0_179] : memref<2x8x8xf32, #tpu.memory_space<vmem>>, vector<2x8x8xf32>
    tpu.vector_store %arg12[%c0_177, %c0_178, %c0_179], %214 {strides = array<i32>} : memref<2x8x8xf32, #tpu.memory_space<vmem>>, vector<2x8x8xf32>,
    %c0_180 = arith.constant 0 : index
    %c0_181 = arith.constant 0 : index
    %c0_182 = arith.constant 0 : index
    %216 = vector.load %arg13[%c0_180, %c0_181, %c0_182] : memref<2x8x8xf32, #tpu.memory_space<vmem>>, vector<2x8x8xf32>
    %217 = vector.shape_cast %203 : vector<8x8xf32> to vector<1x8x8xf32>
    %218 = vector.broadcast %198 : vector<2x1x8xf32> to vector<2x8x8xf32>
    %219 = vector.broadcast %217 : vector<1x8x8xf32> to vector<2x8x8xf32>
    %220 = arith.mulf %218, %219 : vector<2x8x8xf32>
    %221 = vector.shape_cast %201 : vector<8x8xf32> to vector<1x8x8xf32>
    %222 = vector.broadcast %199 : vector<2x1x8xf32> to vector<2x8x8xf32>
    %223 = vector.broadcast %221 : vector<1x8x8xf32> to vector<2x8x8xf32>
    %224 = arith.mulf %222, %223 : vector<2x8x8xf32>
    %225 = arith.addf %220, %224 : vector<2x8x8xf32>
    %226 = arith.addf %216, %225 : vector<2x8x8xf32>
    %c0_183 = arith.constant 0 : index
    %c0_184 = arith.constant 0 : index
    %c0_185 = arith.constant 0 : index
    %227 = vector.load %arg13[%c0_183, %c0_184, %c0_185] : memref<2x8x8xf32, #tpu.memory_space<vmem>>, vector<2x8x8xf32>
    tpu.vector_store %arg13[%c0_183, %c0_184, %c0_185], %226 {strides = array<i32>} : memref<2x8x8xf32, #tpu.memory_space<vmem>>, vector<2x8x8xf32>,
    %c0_186 = arith.constant 0 : index
    %c7 = arith.constant 7 : index
    %c0_187 = arith.constant 0 : index
    %228 = vector.load %arg10[%c0_186, %c7, %c0_187] : memref<2x8x8xf32, #tpu.memory_space<vmem>>, vector<2x1x8xf32>
    %c0_188 = arith.constant 0 : index
    %c7_189 = arith.constant 7 : index
    %c0_190 = arith.constant 0 : index
    %229 = vector.load %arg11[%c0_188, %c7_189, %c0_190] : memref<2x8x8xf32, #tpu.memory_space<vmem>>, vector<2x1x8xf32>
    %c7_191 = arith.constant 7 : index
    %c0_192 = arith.constant 0 : index
    %c0_193 = arith.constant 0 : index
    %230 = vector.load %arg4[%c7_191, %c0_192, %c0_193] : memref<8x8x8xf32, #tpu.memory_space<vmem>>, vector<1x8x8xf32>
    %231 = vector.shape_cast %230 : vector<1x8x8xf32> to vector<8x8xf32>
    %c7_194 = arith.constant 7 : index
    %c0_195 = arith.constant 0 : index
    %c0_196 = arith.constant 0 : index
    %232 = vector.load %arg5[%c7_194, %c0_195, %c0_196] : memref<8x8x8xf32, #tpu.memory_space<vmem>>, vector<1x8x8xf32>
    %233 = vector.shape_cast %232 : vector<1x8x8xf32> to vector<8x8xf32>
    %c0_197 = arith.constant 0 : index
    %c0_198 = arith.constant 0 : index
    %c0_199 = arith.constant 0 : index
    %234 = vector.load %arg12[%c0_197, %c0_198, %c0_199] : memref<2x8x8xf32, #tpu.memory_space<vmem>>, vector<2x8x8xf32>
    %235 = vector.shape_cast %231 : vector<8x8xf32> to vector<1x8x8xf32>
    %236 = vector.broadcast %228 : vector<2x1x8xf32> to vector<2x8x8xf32>
    %237 = vector.broadcast %235 : vector<1x8x8xf32> to vector<2x8x8xf32>
    %238 = arith.mulf %236, %237 : vector<2x8x8xf32>
    %239 = vector.shape_cast %233 : vector<8x8xf32> to vector<1x8x8xf32>
    %240 = vector.broadcast %229 : vector<2x1x8xf32> to vector<2x8x8xf32>
    %241 = vector.broadcast %239 : vector<1x8x8xf32> to vector<2x8x8xf32>
    %242 = arith.mulf %240, %241 : vector<2x8x8xf32>
    %243 = arith.subf %238, %242 : vector<2x8x8xf32>
    %244 = arith.addf %234, %243 : vector<2x8x8xf32>
    %c0_200 = arith.constant 0 : index
    %c0_201 = arith.constant 0 : index
    %c0_202 = arith.constant 0 : index
    %245 = vector.load %arg12[%c0_200, %c0_201, %c0_202] : memref<2x8x8xf32, #tpu.memory_space<vmem>>, vector<2x8x8xf32>
    tpu.vector_store %arg12[%c0_200, %c0_201, %c0_202], %244 {strides = array<i32>} : memref<2x8x8xf32, #tpu.memory_space<vmem>>, vector<2x8x8xf32>,
    %c0_203 = arith.constant 0 : index
    %c0_204 = arith.constant 0 : index
    %c0_205 = arith.constant 0 : index
    %246 = vector.load %arg13[%c0_203, %c0_204, %c0_205] : memref<2x8x8xf32, #tpu.memory_space<vmem>>, vector<2x8x8xf32>
    %247 = vector.shape_cast %233 : vector<8x8xf32> to vector<1x8x8xf32>
    %248 = vector.broadcast %228 : vector<2x1x8xf32> to vector<2x8x8xf32>
    %249 = vector.broadcast %247 : vector<1x8x8xf32> to vector<2x8x8xf32>
    %250 = arith.mulf %248, %249 : vector<2x8x8xf32>
    %251 = vector.shape_cast %231 : vector<8x8xf32> to vector<1x8x8xf32>
    %252 = vector.broadcast %229 : vector<2x1x8xf32> to vector<2x8x8xf32>
    %253 = vector.broadcast %251 : vector<1x8x8xf32> to vector<2x8x8xf32>
    %254 = arith.mulf %252, %253 : vector<2x8x8xf32>
    %255 = arith.addf %250, %254 : vector<2x8x8xf32>
    %256 = arith.addf %246, %255 : vector<2x8x8xf32>
    %c0_206 = arith.constant 0 : index
    %c0_207 = arith.constant 0 : index
    %c0_208 = arith.constant 0 : index
    %257 = vector.load %arg13[%c0_206, %c0_207, %c0_208] : memref<2x8x8xf32, #tpu.memory_space<vmem>>, vector<2x8x8xf32>
    tpu.vector_store %arg13[%c0_206, %c0_207, %c0_208], %256 {strides = array<i32>} : memref<2x8x8xf32, #tpu.memory_space<vmem>>, vector<2x8x8xf32>,
    %c0_209 = arith.constant 0 : index
    %c0_210 = arith.constant 0 : index
    %c0_211 = arith.constant 0 : index
    %258 = vector.load %arg12[%c0_209, %c0_210, %c0_211] : memref<2x8x8xf32, #tpu.memory_space<vmem>>, vector<2x8x8xf32>
    %259 = vector.shape_cast %258 : vector<2x8x8xf32> to vector<16x8xf32>
    %c0_212 = arith.constant 0 : index
    %c0_213 = arith.constant 0 : index
    %260 = vector.load %arg7[%c0_212, %c0_213] : memref<8x128xf32, #tpu.memory_space<vmem>>, vector<8x128xf32>
    %cst_214 = arith.constant dense<0.000000e+00> : vector<16x128xf32>
    %261 = tpu.matmul %259, %260, %cst_214 {dimension_numbers = #tpu.dot_dimension_numbers<[1], [0], [0], [1], [0, 0, 1, 1], [], []>} : vector<16x8xf32>, vector<8x128xf32>, vector<16x128xf32> -> vector<16x128xf32>
    %c0_215 = arith.constant 0 : index
    %c0_216 = arith.constant 0 : index
    %c0_217 = arith.constant 0 : index
    %262 = vector.load %arg13[%c0_215, %c0_216, %c0_217] : memref<2x8x8xf32, #tpu.memory_space<vmem>>, vector<2x8x8xf32>
    %263 = vector.shape_cast %262 : vector<2x8x8xf32> to vector<16x8xf32>
    %c0_218 = arith.constant 0 : index
    %c0_219 = arith.constant 0 : index
    %264 = vector.load %arg8[%c0_218, %c0_219] : memref<8x128xf32, #tpu.memory_space<vmem>>, vector<8x128xf32>
    %cst_220 = arith.constant dense<0.000000e+00> : vector<16x128xf32>
    %265 = tpu.matmul %263, %264, %cst_220 {dimension_numbers = #tpu.dot_dimension_numbers<[1], [0], [0], [1], [0, 0, 1, 1], [], []>} : vector<16x8xf32>, vector<8x128xf32>, vector<16x128xf32> -> vector<16x128xf32>
    %266 = arith.addf %261, %265 : vector<16x128xf32>
    %c0_221 = arith.constant 0 : index
    %c0_222 = arith.constant 0 : index
    %267 = vector.load %arg9[%c0_221, %c0_222] : memref<16x128xf32, #tpu.memory_space<vmem>>, vector<16x128xf32>
    tpu.vector_store %arg9[%c0_221, %c0_222], %266 {strides = array<i32>} : memref<16x128xf32, #tpu.memory_space<vmem>>, vector<16x128xf32>,
    return
  }
  func.func @transform_0(%arg0: i32) -> (i32, i32) {
    %c0_i32 = arith.constant 0 : i32
    %c0_i32_0 = arith.constant 0 : i32
    return %arg0, %c0_i32 : i32, i32
  }
  func.func @transform_1(%arg0: i32) -> (i32, i32) {
    %c0_i32 = arith.constant 0 : i32
    %c0_i32_0 = arith.constant 0 : i32
    %c0_i32_1 = arith.constant 0 : i32
    return %c0_i32, %c0_i32_0 : i32, i32
  }
  func.func @transform_2(%arg0: i32) -> (i32, i32) {
    %c0_i32 = arith.constant 0 : i32
    %c0_i32_0 = arith.constant 0 : i32
    %c0_i32_1 = arith.constant 0 : i32
    return %c0_i32, %c0_i32_0 : i32, i32
  }
  func.func @transform_3(%arg0: i32) -> (i32, i32, i32) {
    %c0_i32 = arith.constant 0 : i32
    %c0_i32_0 = arith.constant 0 : i32
    %c0_i32_1 = arith.constant 0 : i32
    %c0_i32_2 = arith.constant 0 : i32
    return %c0_i32, %c0_i32_0, %c0_i32_1 : i32, i32, i32
  }
  func.func @transform_4(%arg0: i32) -> (i32, i32, i32) {
    %c0_i32 = arith.constant 0 : i32
    %c0_i32_0 = arith.constant 0 : i32
    %c0_i32_1 = arith.constant 0 : i32
    %c0_i32_2 = arith.constant 0 : i32
    return %c0_i32, %c0_i32_0, %c0_i32_1 : i32, i32, i32
  }
  func.func @transform_5(%arg0: i32) -> (i32, i32) {
    %c0_i32 = arith.constant 0 : i32
    %c0_i32_0 = arith.constant 0 : i32
    %c0_i32_1 = arith.constant 0 : i32
    return %c0_i32, %c0_i32_0 : i32, i32
  }
  func.func @transform_6(%arg0: i32) -> (i32, i32) {
    %c0_i32 = arith.constant 0 : i32
    %c0_i32_0 = arith.constant 0 : i32
    %c0_i32_1 = arith.constant 0 : i32
    return %c0_i32, %c0_i32_0 : i32, i32
  }
  func.func @transform_7(%arg0: i32) -> (i32, i32) {
    %c0_i32 = arith.constant 0 : i32
    %c0_i32_0 = arith.constant 0 : i32
    %c0_i32_1 = arith.constant 0 : i32
    return %c0_i32, %c0_i32_0 : i32, i32
  }
  func.func @transform_8(%arg0: i32) -> (i32, i32) {
    %c0_i32 = arith.constant 0 : i32
    %c0_i32_0 = arith.constant 0 : i32
    return %arg0, %c0_i32 : i32, i32
  }
}

module attributes {stable_mosaic.version = 11 : i64} {
  func.func @spectral_conv1d_kernel(%arg0: i32, %arg1: memref<16x16xf32, #tpu.memory_space<vmem>>, %arg2: memref<16x8xf32, #tpu.memory_space<vmem>>, %arg3: memref<16x8xf32, #tpu.memory_space<vmem>>, %arg4: memref<8x8x8xf32, #tpu.memory_space<vmem>>, %arg5: memref<8x8x8xf32, #tpu.memory_space<vmem>>, %arg6: memref<8x8xf32, #tpu.memory_space<vmem>>, %arg7: memref<8x128xf32, #tpu.memory_space<vmem>>, %arg8: memref<8x128xf32, #tpu.memory_space<vmem>>, %arg9: memref<16x128xf32, #tpu.memory_space<vmem>>, %arg10: memref<2x8x8xf32, #tpu.memory_space<vmem>>, %arg11: memref<2x8x8xf32, #tpu.memory_space<vmem>>, %arg12: memref<2x8x8xf32, #tpu.memory_space<vmem>>, %arg13: memref<2x8x8xf32, #tpu.memory_space<vmem>>) attributes {dimension_semantics = [#tpu.dimension_semantics<parallel>], iteration_bounds = array<i64: 1>, scalar_prefetch = 0 : i64, scratch_operands = 4 : i64, tpu.core_type = #tpu.core_type<tc>, window_params = [{transform_indices = @transform_0, window_bounds = array<i64: 16, 16>}, {pipeline_mode = #tpu.pipeline_mode<synchronous>, transform_indices = @transform_1, window_bounds = array<i64: 16, 8>}, {pipeline_mode = #tpu.pipeline_mode<synchronous>, transform_indices = @transform_2, window_bounds = array<i64: 16, 8>}, {pipeline_mode = #tpu.pipeline_mode<synchronous>, transform_indices = @transform_3, window_bounds = array<i64: 8, 8, 8>}, {pipeline_mode = #tpu.pipeline_mode<synchronous>, transform_indices = @transform_4, window_bounds = array<i64: 8, 8, 8>}, {pipeline_mode = #tpu.pipeline_mode<synchronous>, transform_indices = @transform_5, window_bounds = array<i64: 8, 8>}, {pipeline_mode = #tpu.pipeline_mode<synchronous>, transform_indices = @transform_6, window_bounds = array<i64: 8, 128>}, {pipeline_mode = #tpu.pipeline_mode<synchronous>, transform_indices = @transform_7, window_bounds = array<i64: 8, 128>}, {transform_indices = @transform_8, window_bounds = array<i64: 16, 128>}]} {
    %c0 = arith.constant 0 : index
    %c0_0 = arith.constant 0 : index
    %0 = vector.load %arg1[%c0, %c0_0] : memref<16x16xf32, #tpu.memory_space<vmem>>, vector<16x16xf32>
    %c0_1 = arith.constant 0 : index
    %c0_2 = arith.constant 0 : index
    %1 = vector.load %arg2[%c0_1, %c0_2] : memref<16x8xf32, #tpu.memory_space<vmem>>, vector<16x8xf32>
    %cst = arith.constant dense<0.000000e+00> : vector<16x8xf32>
    %2 = tpu.matmul %0, %1, %cst {dimension_numbers = #tpu.dot_dimension_numbers<[1], [0], [0], [1], [0, 0, 1, 1], [], []>} : vector<16x16xf32>, vector<16x8xf32>, vector<16x8xf32> -> vector<16x8xf32>
    %3 = vector.shape_cast %2 : vector<16x8xf32> to vector<2x8x8xf32>
    %c0_3 = arith.constant 0 : index
    %c0_4 = arith.constant 0 : index
    %c0_5 = arith.constant 0 : index
    %4 = vector.load %arg10[%c0_3, %c0_4, %c0_5] : memref<2x8x8xf32, #tpu.memory_space<vmem>>, vector<2x8x8xf32>
    tpu.vector_store %arg10[%c0_3, %c0_4, %c0_5], %3 {strides = array<i32>} : memref<2x8x8xf32, #tpu.memory_space<vmem>>, vector<2x8x8xf32>,
    %c0_6 = arith.constant 0 : index
    %c0_7 = arith.constant 0 : index
    %5 = vector.load %arg1[%c0_6, %c0_7] : memref<16x16xf32, #tpu.memory_space<vmem>>, vector<16x16xf32>
    %c0_8 = arith.constant 0 : index
    %c0_9 = arith.constant 0 : index
    %6 = vector.load %arg3[%c0_8, %c0_9] : memref<16x8xf32, #tpu.memory_space<vmem>>, vector<16x8xf32>
    %cst_10 = arith.constant dense<0.000000e+00> : vector<16x8xf32>
    %7 = tpu.matmul %5, %6, %cst_10 {dimension_numbers = #tpu.dot_dimension_numbers<[1], [0], [0], [1], [0, 0, 1, 1], [], []>} : vector<16x16xf32>, vector<16x8xf32>, vector<16x8xf32> -> vector<16x8xf32>
    %8 = vector.shape_cast %7 : vector<16x8xf32> to vector<2x8x8xf32>
    %c0_11 = arith.constant 0 : index
    %c0_12 = arith.constant 0 : index
    %c0_13 = arith.constant 0 : index
    %9 = vector.load %arg11[%c0_11, %c0_12, %c0_13] : memref<2x8x8xf32, #tpu.memory_space<vmem>>, vector<2x8x8xf32>
    tpu.vector_store %arg11[%c0_11, %c0_12, %c0_13], %8 {strides = array<i32>} : memref<2x8x8xf32, #tpu.memory_space<vmem>>, vector<2x8x8xf32>,
    %cst_14 = arith.constant 0.000000e+00 : f32
    %10 = vector.broadcast %cst_14 : f32 to vector<2x8x8xf32>
    %c0_15 = arith.constant 0 : index
    %c0_16 = arith.constant 0 : index
    %11 = vector.load %arg6[%c0_15, %c0_16] : memref<8x8xf32, #tpu.memory_space<vmem>>, vector<8x8xf32>
    %12 = vector.shape_cast %11 : vector<8x8xf32> to vector<1x8x8xf32>
    %13 = vector.broadcast %12 : vector<1x8x8xf32> to vector<2x8x8xf32>
    %14 = arith.addf %10, %13 : vector<2x8x8xf32>
    %c0_17 = arith.constant 0 : index
    %c0_18 = arith.constant 0 : index
    %c0_19 = arith.constant 0 : index
    %15 = vector.load %arg12[%c0_17, %c0_18, %c0_19] : memref<2x8x8xf32, #tpu.memory_space<vmem>>, vector<2x8x8xf32>
    tpu.vector_store %arg12[%c0_17, %c0_18, %c0_19], %14 {strides = array<i32>} : memref<2x8x8xf32, #tpu.memory_space<vmem>>, vector<2x8x8xf32>,
    %cst_20 = arith.constant 0.000000e+00 : f32
    %16 = vector.broadcast %cst_20 : f32 to vector<2x8x8xf32>
    %c0_21 = arith.constant 0 : index
    %c0_22 = arith.constant 0 : index
    %c0_23 = arith.constant 0 : index
    %17 = vector.load %arg13[%c0_21, %c0_22, %c0_23] : memref<2x8x8xf32, #tpu.memory_space<vmem>>, vector<2x8x8xf32>
    tpu.vector_store %arg13[%c0_21, %c0_22, %c0_23], %16 {strides = array<i32>} : memref<2x8x8xf32, #tpu.memory_space<vmem>>, vector<2x8x8xf32>,
    %c0_24 = arith.constant 0 : index
    %c0_25 = arith.constant 0 : index
    %c0_26 = arith.constant 0 : index
    %18 = vector.load %arg10[%c0_24, %c0_25, %c0_26] : memref<2x8x8xf32, #tpu.memory_space<vmem>>, vector<2x1x8xf32>
    %c0_27 = arith.constant 0 : index
    %c0_28 = arith.constant 0 : index
    %c0_29 = arith.constant 0 : index
    %19 = vector.load %arg11[%c0_27, %c0_28, %c0_29] : memref<2x8x8xf32, #tpu.memory_space<vmem>>, vector<2x1x8xf32>
    %c0_30 = arith.constant 0 : index
    %c0_31 = arith.constant 0 : index
    %c0_32 = arith.constant 0 : index
    %20 = vector.load %arg4[%c0_30, %c0_31, %c0_32] : memref<8x8x8xf32, #tpu.memory_space<vmem>>, vector<1x8x8xf32>
    %21 = vector.shape_cast %20 : vector<1x8x8xf32> to vector<8x8xf32>
    %c0_33 = arith.constant 0 : index
    %c0_34 = arith.constant 0 : index
    %c0_35 = arith.constant 0 : index
    %22 = vector.load %arg5[%c0_33, %c0_34, %c0_35] : memref<8x8x8xf32, #tpu.memory_space<vmem>>, vector<1x8x8xf32>
    %23 = vector.shape_cast %22 : vector<1x8x8xf32> to vector<8x8xf32>
    %c0_36 = arith.constant 0 : index
    %c0_37 = arith.constant 0 : index
    %c0_38 = arith.constant 0 : index
    %24 = vector.load %arg12[%c0_36, %c0_37, %c0_38] : memref<2x8x8xf32, #tpu.memory_space<vmem>>, vector<2x8x8xf32>
    %25 = vector.shape_cast %21 : vector<8x8xf32> to vector<1x8x8xf32>
    %26 = vector.broadcast %18 : vector<2x1x8xf32> to vector<2x8x8xf32>
    %27 = vector.broadcast %25 : vector<1x8x8xf32> to vector<2x8x8xf32>
    %28 = arith.mulf %26, %27 : vector<2x8x8xf32>
    %29 = vector.shape_cast %23 : vector<8x8xf32> to vector<1x8x8xf32>
    %30 = vector.broadcast %19 : vector<2x1x8xf32> to vector<2x8x8xf32>
    %31 = vector.broadcast %29 : vector<1x8x8xf32> to vector<2x8x8xf32>
    %32 = arith.mulf %30, %31 : vector<2x8x8xf32>
    %33 = arith.subf %28, %32 : vector<2x8x8xf32>
    %34 = arith.addf %24, %33 : vector<2x8x8xf32>
    %c0_39 = arith.constant 0 : index
    %c0_40 = arith.constant 0 : index
    %c0_41 = arith.constant 0 : index
    %35 = vector.load %arg12[%c0_39, %c0_40, %c0_41] : memref<2x8x8xf32, #tpu.memory_space<vmem>>, vector<2x8x8xf32>
    tpu.vector_store %arg12[%c0_39, %c0_40, %c0_41], %34 {strides = array<i32>} : memref<2x8x8xf32, #tpu.memory_space<vmem>>, vector<2x8x8xf32>,
    %c0_42 = arith.constant 0 : index
    %c0_43 = arith.constant 0 : index
    %c0_44 = arith.constant 0 : index
    %36 = vector.load %arg13[%c0_42, %c0_43, %c0_44] : memref<2x8x8xf32, #tpu.memory_space<vmem>>, vector<2x8x8xf32>
    %37 = vector.shape_cast %23 : vector<8x8xf32> to vector<1x8x8xf32>
    %38 = vector.broadcast %18 : vector<2x1x8xf32> to vector<2x8x8xf32>
    %39 = vector.broadcast %37 : vector<1x8x8xf32> to vector<2x8x8xf32>
    %40 = arith.mulf %38, %39 : vector<2x8x8xf32>
    %41 = vector.shape_cast %21 : vector<8x8xf32> to vector<1x8x8xf32>
    %42 = vector.broadcast %19 : vector<2x1x8xf32> to vector<2x8x8xf32>
    %43 = vector.broadcast %41 : vector<1x8x8xf32> to vector<2x8x8xf32>
    %44 = arith.mulf %42, %43 : vector<2x8x8xf32>
    %45 = arith.addf %40, %44 : vector<2x8x8xf32>
    %46 = arith.addf %36, %45 : vector<2x8x8xf32>
    %c0_45 = arith.constant 0 : index
    %c0_46 = arith.constant 0 : index
    %c0_47 = arith.constant 0 : index
    %47 = vector.load %arg13[%c0_45, %c0_46, %c0_47] : memref<2x8x8xf32, #tpu.memory_space<vmem>>, vector<2x8x8xf32>
    tpu.vector_store %arg13[%c0_45, %c0_46, %c0_47], %46 {strides = array<i32>} : memref<2x8x8xf32, #tpu.memory_space<vmem>>, vector<2x8x8xf32>,
    %c0_48 = arith.constant 0 : index
    %c1 = arith.constant 1 : index
    %c0_49 = arith.constant 0 : index
    %48 = vector.load %arg10[%c0_48, %c1, %c0_49] : memref<2x8x8xf32, #tpu.memory_space<vmem>>, vector<2x1x8xf32>
    %c0_50 = arith.constant 0 : index
    %c1_51 = arith.constant 1 : index
    %c0_52 = arith.constant 0 : index
    %49 = vector.load %arg11[%c0_50, %c1_51, %c0_52] : memref<2x8x8xf32, #tpu.memory_space<vmem>>, vector<2x1x8xf32>
    %c1_53 = arith.constant 1 : index
    %c0_54 = arith.constant 0 : index
    %c0_55 = arith.constant 0 : index
    %50 = vector.load %arg4[%c1_53, %c0_54, %c0_55] : memref<8x8x8xf32, #tpu.memory_space<vmem>>, vector<1x8x8xf32>
    %51 = vector.shape_cast %50 : vector<1x8x8xf32> to vector<8x8xf32>
    %c1_56 = arith.constant 1 : index
    %c0_57 = arith.constant 0 : index
    %c0_58 = arith.constant 0 : index
    %52 = vector.load %arg5[%c1_56, %c0_57, %c0_58] : memref<8x8x8xf32, #tpu.memory_space<vmem>>, vector<1x8x8xf32>
    %53 = vector.shape_cast %52 : vector<1x8x8xf32> to vector<8x8xf32>
    %c0_59 = arith.constant 0 : index
    %c0_60 = arith.constant 0 : index
    %c0_61 = arith.constant 0 : index
    %54 = vector.load %arg12[%c0_59, %c0_60, %c0_61] : memref<2x8x8xf32, #tpu.memory_space<vmem>>, vector<2x8x8xf32>
    %55 = vector.shape_cast %51 : vector<8x8xf32> to vector<1x8x8xf32>
    %56 = vector.broadcast %48 : vector<2x1x8xf32> to vector<2x8x8xf32>
    %57 = vector.broadcast %55 : vector<1x8x8xf32> to vector<2x8x8xf32>
    %58 = arith.mulf %56, %57 : vector<2x8x8xf32>
    %59 = vector.shape_cast %53 : vector<8x8xf32> to vector<1x8x8xf32>
    %60 = vector.broadcast %49 : vector<2x1x8xf32> to vector<2x8x8xf32>
    %61 = vector.broadcast %59 : vector<1x8x8xf32> to vector<2x8x8xf32>
    %62 = arith.mulf %60, %61 : vector<2x8x8xf32>
    %63 = arith.subf %58, %62 : vector<2x8x8xf32>
    %64 = arith.addf %54, %63 : vector<2x8x8xf32>
    %c0_62 = arith.constant 0 : index
    %c0_63 = arith.constant 0 : index
    %c0_64 = arith.constant 0 : index
    %65 = vector.load %arg12[%c0_62, %c0_63, %c0_64] : memref<2x8x8xf32, #tpu.memory_space<vmem>>, vector<2x8x8xf32>
    tpu.vector_store %arg12[%c0_62, %c0_63, %c0_64], %64 {strides = array<i32>} : memref<2x8x8xf32, #tpu.memory_space<vmem>>, vector<2x8x8xf32>,
    %c0_65 = arith.constant 0 : index
    %c0_66 = arith.constant 0 : index
    %c0_67 = arith.constant 0 : index
    %66 = vector.load %arg13[%c0_65, %c0_66, %c0_67] : memref<2x8x8xf32, #tpu.memory_space<vmem>>, vector<2x8x8xf32>
    %67 = vector.shape_cast %53 : vector<8x8xf32> to vector<1x8x8xf32>
    %68 = vector.broadcast %48 : vector<2x1x8xf32> to vector<2x8x8xf32>
    %69 = vector.broadcast %67 : vector<1x8x8xf32> to vector<2x8x8xf32>
    %70 = arith.mulf %68, %69 : vector<2x8x8xf32>
    %71 = vector.shape_cast %51 : vector<8x8xf32> to vector<1x8x8xf32>
    %72 = vector.broadcast %49 : vector<2x1x8xf32> to vector<2x8x8xf32>
    %73 = vector.broadcast %71 : vector<1x8x8xf32> to vector<2x8x8xf32>
    %74 = arith.mulf %72, %73 : vector<2x8x8xf32>
    %75 = arith.addf %70, %74 : vector<2x8x8xf32>
    %76 = arith.addf %66, %75 : vector<2x8x8xf32>
    %c0_68 = arith.constant 0 : index
    %c0_69 = arith.constant 0 : index
    %c0_70 = arith.constant 0 : index
    %77 = vector.load %arg13[%c0_68, %c0_69, %c0_70] : memref<2x8x8xf32, #tpu.memory_space<vmem>>, vector<2x8x8xf32>
    tpu.vector_store %arg13[%c0_68, %c0_69, %c0_70], %76 {strides = array<i32>} : memref<2x8x8xf32, #tpu.memory_space<vmem>>, vector<2x8x8xf32>,
    %c0_71 = arith.constant 0 : index
    %c2 = arith.constant 2 : index
    %c0_72 = arith.constant 0 : index
    %78 = vector.load %arg10[%c0_71, %c2, %c0_72] : memref<2x8x8xf32, #tpu.memory_space<vmem>>, vector<2x1x8xf32>
    %c0_73 = arith.constant 0 : index
    %c2_74 = arith.constant 2 : index
    %c0_75 = arith.constant 0 : index
    %79 = vector.load %arg11[%c0_73, %c2_74, %c0_75] : memref<2x8x8xf32, #tpu.memory_space<vmem>>, vector<2x1x8xf32>
    %c2_76 = arith.constant 2 : index
    %c0_77 = arith.constant 0 : index
    %c0_78 = arith.constant 0 : index
    %80 = vector.load %arg4[%c2_76, %c0_77, %c0_78] : memref<8x8x8xf32, #tpu.memory_space<vmem>>, vector<1x8x8xf32>
    %81 = vector.shape_cast %80 : vector<1x8x8xf32> to vector<8x8xf32>
    %c2_79 = arith.constant 2 : index
    %c0_80 = arith.constant 0 : index
    %c0_81 = arith.constant 0 : index
    %82 = vector.load %arg5[%c2_79, %c0_80, %c0_81] : memref<8x8x8xf32, #tpu.memory_space<vmem>>, vector<1x8x8xf32>
    %83 = vector.shape_cast %82 : vector<1x8x8xf32> to vector<8x8xf32>
    %c0_82 = arith.constant 0 : index
    %c0_83 = arith.constant 0 : index
    %c0_84 = arith.constant 0 : index
    %84 = vector.load %arg12[%c0_82, %c0_83, %c0_84] : memref<2x8x8xf32, #tpu.memory_space<vmem>>, vector<2x8x8xf32>
    %85 = vector.shape_cast %81 : vector<8x8xf32> to vector<1x8x8xf32>
    %86 = vector.broadcast %78 : vector<2x1x8xf32> to vector<2x8x8xf32>
    %87 = vector.broadcast %85 : vector<1x8x8xf32> to vector<2x8x8xf32>
    %88 = arith.mulf %86, %87 : vector<2x8x8xf32>
    %89 = vector.shape_cast %83 : vector<8x8xf32> to vector<1x8x8xf32>
    %90 = vector.broadcast %79 : vector<2x1x8xf32> to vector<2x8x8xf32>
    %91 = vector.broadcast %89 : vector<1x8x8xf32> to vector<2x8x8xf32>
    %92 = arith.mulf %90, %91 : vector<2x8x8xf32>
    %93 = arith.subf %88, %92 : vector<2x8x8xf32>
    %94 = arith.addf %84, %93 : vector<2x8x8xf32>
    %c0_85 = arith.constant 0 : index
    %c0_86 = arith.constant 0 : index
    %c0_87 = arith.constant 0 : index
    %95 = vector.load %arg12[%c0_85, %c0_86, %c0_87] : memref<2x8x8xf32, #tpu.memory_space<vmem>>, vector<2x8x8xf32>
    tpu.vector_store %arg12[%c0_85, %c0_86, %c0_87], %94 {strides = array<i32>} : memref<2x8x8xf32, #tpu.memory_space<vmem>>, vector<2x8x8xf32>,
    %c0_88 = arith.constant 0 : index
    %c0_89 = arith.constant 0 : index
    %c0_90 = arith.constant 0 : index
    %96 = vector.load %arg13[%c0_88, %c0_89, %c0_90] : memref<2x8x8xf32, #tpu.memory_space<vmem>>, vector<2x8x8xf32>
    %97 = vector.shape_cast %83 : vector<8x8xf32> to vector<1x8x8xf32>
    %98 = vector.broadcast %78 : vector<2x1x8xf32> to vector<2x8x8xf32>
    %99 = vector.broadcast %97 : vector<1x8x8xf32> to vector<2x8x8xf32>
    %100 = arith.mulf %98, %99 : vector<2x8x8xf32>
    %101 = vector.shape_cast %81 : vector<8x8xf32> to vector<1x8x8xf32>
    %102 = vector.broadcast %79 : vector<2x1x8xf32> to vector<2x8x8xf32>
    %103 = vector.broadcast %101 : vector<1x8x8xf32> to vector<2x8x8xf32>
    %104 = arith.mulf %102, %103 : vector<2x8x8xf32>
    %105 = arith.addf %100, %104 : vector<2x8x8xf32>
    %106 = arith.addf %96, %105 : vector<2x8x8xf32>
    %c0_91 = arith.constant 0 : index
    %c0_92 = arith.constant 0 : index
    %c0_93 = arith.constant 0 : index
    %107 = vector.load %arg13[%c0_91, %c0_92, %c0_93] : memref<2x8x8xf32, #tpu.memory_space<vmem>>, vector<2x8x8xf32>
    tpu.vector_store %arg13[%c0_91, %c0_92, %c0_93], %106 {strides = array<i32>} : memref<2x8x8xf32, #tpu.memory_space<vmem>>, vector<2x8x8xf32>,
    %c0_94 = arith.constant 0 : index
    %c3 = arith.constant 3 : index
    %c0_95 = arith.constant 0 : index
    %108 = vector.load %arg10[%c0_94, %c3, %c0_95] : memref<2x8x8xf32, #tpu.memory_space<vmem>>, vector<2x1x8xf32>
    %c0_96 = arith.constant 0 : index
    %c3_97 = arith.constant 3 : index
    %c0_98 = arith.constant 0 : index
    %109 = vector.load %arg11[%c0_96, %c3_97, %c0_98] : memref<2x8x8xf32, #tpu.memory_space<vmem>>, vector<2x1x8xf32>
    %c3_99 = arith.constant 3 : index
    %c0_100 = arith.constant 0 : index
    %c0_101 = arith.constant 0 : index
    %110 = vector.load %arg4[%c3_99, %c0_100, %c0_101] : memref<8x8x8xf32, #tpu.memory_space<vmem>>, vector<1x8x8xf32>
    %111 = vector.shape_cast %110 : vector<1x8x8xf32> to vector<8x8xf32>
    %c3_102 = arith.constant 3 : index
    %c0_103 = arith.constant 0 : index
    %c0_104 = arith.constant 0 : index
    %112 = vector.load %arg5[%c3_102, %c0_103, %c0_104] : memref<8x8x8xf32, #tpu.memory_space<vmem>>, vector<1x8x8xf32>
    %113 = vector.shape_cast %112 : vector<1x8x8xf32> to vector<8x8xf32>
    %c0_105 = arith.constant 0 : index
    %c0_106 = arith.constant 0 : index
    %c0_107 = arith.constant 0 : index
    %114 = vector.load %arg12[%c0_105, %c0_106, %c0_107] : memref<2x8x8xf32, #tpu.memory_space<vmem>>, vector<2x8x8xf32>
    %115 = vector.shape_cast %111 : vector<8x8xf32> to vector<1x8x8xf32>
    %116 = vector.broadcast %108 : vector<2x1x8xf32> to vector<2x8x8xf32>
    %117 = vector.broadcast %115 : vector<1x8x8xf32> to vector<2x8x8xf32>
    %118 = arith.mulf %116, %117 : vector<2x8x8xf32>
    %119 = vector.shape_cast %113 : vector<8x8xf32> to vector<1x8x8xf32>
    %120 = vector.broadcast %109 : vector<2x1x8xf32> to vector<2x8x8xf32>
    %121 = vector.broadcast %119 : vector<1x8x8xf32> to vector<2x8x8xf32>
    %122 = arith.mulf %120, %121 : vector<2x8x8xf32>
    %123 = arith.subf %118, %122 : vector<2x8x8xf32>
    %124 = arith.addf %114, %123 : vector<2x8x8xf32>
    %c0_108 = arith.constant 0 : index
    %c0_109 = arith.constant 0 : index
    %c0_110 = arith.constant 0 : index
    %125 = vector.load %arg12[%c0_108, %c0_109, %c0_110] : memref<2x8x8xf32, #tpu.memory_space<vmem>>, vector<2x8x8xf32>
    tpu.vector_store %arg12[%c0_108, %c0_109, %c0_110], %124 {strides = array<i32>} : memref<2x8x8xf32, #tpu.memory_space<vmem>>, vector<2x8x8xf32>,
    %c0_111 = arith.constant 0 : index
    %c0_112 = arith.constant 0 : index
    %c0_113 = arith.constant 0 : index
    %126 = vector.load %arg13[%c0_111, %c0_112, %c0_113] : memref<2x8x8xf32, #tpu.memory_space<vmem>>, vector<2x8x8xf32>
    %127 = vector.shape_cast %113 : vector<8x8xf32> to vector<1x8x8xf32>
    %128 = vector.broadcast %108 : vector<2x1x8xf32> to vector<2x8x8xf32>
    %129 = vector.broadcast %127 : vector<1x8x8xf32> to vector<2x8x8xf32>
    %130 = arith.mulf %128, %129 : vector<2x8x8xf32>
    %131 = vector.shape_cast %111 : vector<8x8xf32> to vector<1x8x8xf32>
    %132 = vector.broadcast %109 : vector<2x1x8xf32> to vector<2x8x8xf32>
    %133 = vector.broadcast %131 : vector<1x8x8xf32> to vector<2x8x8xf32>
    %134 = arith.mulf %132, %133 : vector<2x8x8xf32>
    %135 = arith.addf %130, %134 : vector<2x8x8xf32>
    %136 = arith.addf %126, %135 : vector<2x8x8xf32>
    %c0_114 = arith.constant 0 : index
    %c0_115 = arith.constant 0 : index
    %c0_116 = arith.constant 0 : index
    %137 = vector.load %arg13[%c0_114, %c0_115, %c0_116] : memref<2x8x8xf32, #tpu.memory_space<vmem>>, vector<2x8x8xf32>
    tpu.vector_store %arg13[%c0_114, %c0_115, %c0_116], %136 {strides = array<i32>} : memref<2x8x8xf32, #tpu.memory_space<vmem>>, vector<2x8x8xf32>,
    %c0_117 = arith.constant 0 : index
    %c4 = arith.constant 4 : index
    %c0_118 = arith.constant 0 : index
    %138 = vector.load %arg10[%c0_117, %c4, %c0_118] : memref<2x8x8xf32, #tpu.memory_space<vmem>>, vector<2x1x8xf32>
    %c0_119 = arith.constant 0 : index
    %c4_120 = arith.constant 4 : index
    %c0_121 = arith.constant 0 : index
    %139 = vector.load %arg11[%c0_119, %c4_120, %c0_121] : memref<2x8x8xf32, #tpu.memory_space<vmem>>, vector<2x1x8xf32>
    %c4_122 = arith.constant 4 : index
    %c0_123 = arith.constant 0 : index
    %c0_124 = arith.constant 0 : index
    %140 = vector.load %arg4[%c4_122, %c0_123, %c0_124] : memref<8x8x8xf32, #tpu.memory_space<vmem>>, vector<1x8x8xf32>
    %141 = vector.shape_cast %140 : vector<1x8x8xf32> to vector<8x8xf32>
    %c4_125 = arith.constant 4 : index
    %c0_126 = arith.constant 0 : index
    %c0_127 = arith.constant 0 : index
    %142 = vector.load %arg5[%c4_125, %c0_126, %c0_127] : memref<8x8x8xf32, #tpu.memory_space<vmem>>, vector<1x8x8xf32>
    %143 = vector.shape_cast %142 : vector<1x8x8xf32> to vector<8x8xf32>
    %c0_128 = arith.constant 0 : index
    %c0_129 = arith.constant 0 : index
    %c0_130 = arith.constant 0 : index
    %144 = vector.load %arg12[%c0_128, %c0_129, %c0_130] : memref<2x8x8xf32, #tpu.memory_space<vmem>>, vector<2x8x8xf32>
    %145 = vector.shape_cast %141 : vector<8x8xf32> to vector<1x8x8xf32>
    %146 = vector.broadcast %138 : vector<2x1x8xf32> to vector<2x8x8xf32>
    %147 = vector.broadcast %145 : vector<1x8x8xf32> to vector<2x8x8xf32>
    %148 = arith.mulf %146, %147 : vector<2x8x8xf32>
    %149 = vector.shape_cast %143 : vector<8x8xf32> to vector<1x8x8xf32>
    %150 = vector.broadcast %139 : vector<2x1x8xf32> to vector<2x8x8xf32>
    %151 = vector.broadcast %149 : vector<1x8x8xf32> to vector<2x8x8xf32>
    %152 = arith.mulf %150, %151 : vector<2x8x8xf32>
    %153 = arith.subf %148, %152 : vector<2x8x8xf32>
    %154 = arith.addf %144, %153 : vector<2x8x8xf32>
    %c0_131 = arith.constant 0 : index
    %c0_132 = arith.constant 0 : index
    %c0_133 = arith.constant 0 : index
    %155 = vector.load %arg12[%c0_131, %c0_132, %c0_133] : memref<2x8x8xf32, #tpu.memory_space<vmem>>, vector<2x8x8xf32>
    tpu.vector_store %arg12[%c0_131, %c0_132, %c0_133], %154 {strides = array<i32>} : memref<2x8x8xf32, #tpu.memory_space<vmem>>, vector<2x8x8xf32>,
    %c0_134 = arith.constant 0 : index
    %c0_135 = arith.constant 0 : index
    %c0_136 = arith.constant 0 : index
    %156 = vector.load %arg13[%c0_134, %c0_135, %c0_136] : memref<2x8x8xf32, #tpu.memory_space<vmem>>, vector<2x8x8xf32>
    %157 = vector.shape_cast %143 : vector<8x8xf32> to vector<1x8x8xf32>
    %158 = vector.broadcast %138 : vector<2x1x8xf32> to vector<2x8x8xf32>
    %159 = vector.broadcast %157 : vector<1x8x8xf32> to vector<2x8x8xf32>
    %160 = arith.mulf %158, %159 : vector<2x8x8xf32>
    %161 = vector.shape_cast %141 : vector<8x8xf32> to vector<1x8x8xf32>
    %162 = vector.broadcast %139 : vector<2x1x8xf32> to vector<2x8x8xf32>
    %163 = vector.broadcast %161 : vector<1x8x8xf32> to vector<2x8x8xf32>
    %164 = arith.mulf %162, %163 : vector<2x8x8xf32>
    %165 = arith.addf %160, %164 : vector<2x8x8xf32>
    %166 = arith.addf %156, %165 : vector<2x8x8xf32>
    %c0_137 = arith.constant 0 : index
    %c0_138 = arith.constant 0 : index
    %c0_139 = arith.constant 0 : index
    %167 = vector.load %arg13[%c0_137, %c0_138, %c0_139] : memref<2x8x8xf32, #tpu.memory_space<vmem>>, vector<2x8x8xf32>
    tpu.vector_store %arg13[%c0_137, %c0_138, %c0_139], %166 {strides = array<i32>} : memref<2x8x8xf32, #tpu.memory_space<vmem>>, vector<2x8x8xf32>,
    %c0_140 = arith.constant 0 : index
    %c5 = arith.constant 5 : index
    %c0_141 = arith.constant 0 : index
    %168 = vector.load %arg10[%c0_140, %c5, %c0_141] : memref<2x8x8xf32, #tpu.memory_space<vmem>>, vector<2x1x8xf32>
    %c0_142 = arith.constant 0 : index
    %c5_143 = arith.constant 5 : index
    %c0_144 = arith.constant 0 : index
    %169 = vector.load %arg11[%c0_142, %c5_143, %c0_144] : memref<2x8x8xf32, #tpu.memory_space<vmem>>, vector<2x1x8xf32>
    %c5_145 = arith.constant 5 : index
    %c0_146 = arith.constant 0 : index
    %c0_147 = arith.constant 0 : index
    %170 = vector.load %arg4[%c5_145, %c0_146, %c0_147] : memref<8x8x8xf32, #tpu.memory_space<vmem>>, vector<1x8x8xf32>
    %171 = vector.shape_cast %170 : vector<1x8x8xf32> to vector<8x8xf32>
    %c5_148 = arith.constant 5 : index
    %c0_149 = arith.constant 0 : index
    %c0_150 = arith.constant 0 : index
    %172 = vector.load %arg5[%c5_148, %c0_149, %c0_150] : memref<8x8x8xf32, #tpu.memory_space<vmem>>, vector<1x8x8xf32>
    %173 = vector.shape_cast %172 : vector<1x8x8xf32> to vector<8x8xf32>
    %c0_151 = arith.constant 0 : index
    %c0_152 = arith.constant 0 : index
    %c0_153 = arith.constant 0 : index
    %174 = vector.load %arg12[%c0_151, %c0_152, %c0_153] : memref<2x8x8xf32, #tpu.memory_space<vmem>>, vector<2x8x8xf32>
    %175 = vector.shape_cast %171 : vector<8x8xf32> to vector<1x8x8xf32>
    %176 = vector.broadcast %168 : vector<2x1x8xf32> to vector<2x8x8xf32>
    %177 = vector.broadcast %175 : vector<1x8x8xf32> to vector<2x8x8xf32>
    %178 = arith.mulf %176, %177 : vector<2x8x8xf32>
    %179 = vector.shape_cast %173 : vector<8x8xf32> to vector<1x8x8xf32>
    %180 = vector.broadcast %169 : vector<2x1x8xf32> to vector<2x8x8xf32>
    %181 = vector.broadcast %179 : vector<1x8x8xf32> to vector<2x8x8xf32>
    %182 = arith.mulf %180, %181 : vector<2x8x8xf32>
    %183 = arith.subf %178, %182 : vector<2x8x8xf32>
    %184 = arith.addf %174, %183 : vector<2x8x8xf32>
    %c0_154 = arith.constant 0 : index
    %c0_155 = arith.constant 0 : index
    %c0_156 = arith.constant 0 : index
    %185 = vector.load %arg12[%c0_154, %c0_155, %c0_156] : memref<2x8x8xf32, #tpu.memory_space<vmem>>, vector<2x8x8xf32>
    tpu.vector_store %arg12[%c0_154, %c0_155, %c0_156], %184 {strides = array<i32>} : memref<2x8x8xf32, #tpu.memory_space<vmem>>, vector<2x8x8xf32>,
    %c0_157 = arith.constant 0 : index
    %c0_158 = arith.constant 0 : index
    %c0_159 = arith.constant 0 : index
    %186 = vector.load %arg13[%c0_157, %c0_158, %c0_159] : memref<2x8x8xf32, #tpu.memory_space<vmem>>, vector<2x8x8xf32>
    %187 = vector.shape_cast %173 : vector<8x8xf32> to vector<1x8x8xf32>
    %188 = vector.broadcast %168 : vector<2x1x8xf32> to vector<2x8x8xf32>
    %189 = vector.broadcast %187 : vector<1x8x8xf32> to vector<2x8x8xf32>
    %190 = arith.mulf %188, %189 : vector<2x8x8xf32>
    %191 = vector.shape_cast %171 : vector<8x8xf32> to vector<1x8x8xf32>
    %192 = vector.broadcast %169 : vector<2x1x8xf32> to vector<2x8x8xf32>
    %193 = vector.broadcast %191 : vector<1x8x8xf32> to vector<2x8x8xf32>
    %194 = arith.mulf %192, %193 : vector<2x8x8xf32>
    %195 = arith.addf %190, %194 : vector<2x8x8xf32>
    %196 = arith.addf %186, %195 : vector<2x8x8xf32>
    %c0_160 = arith.constant 0 : index
    %c0_161 = arith.constant 0 : index
    %c0_162 = arith.constant 0 : index
    %197 = vector.load %arg13[%c0_160, %c0_161, %c0_162] : memref<2x8x8xf32, #tpu.memory_space<vmem>>, vector<2x8x8xf32>
    tpu.vector_store %arg13[%c0_160, %c0_161, %c0_162], %196 {strides = array<i32>} : memref<2x8x8xf32, #tpu.memory_space<vmem>>, vector<2x8x8xf32>,
    %c0_163 = arith.constant 0 : index
    %c6 = arith.constant 6 : index
    %c0_164 = arith.constant 0 : index
    %198 = vector.load %arg10[%c0_163, %c6, %c0_164] : memref<2x8x8xf32, #tpu.memory_space<vmem>>, vector<2x1x8xf32>
    %c0_165 = arith.constant 0 : index
    %c6_166 = arith.constant 6 : index
    %c0_167 = arith.constant 0 : index
    %199 = vector.load %arg11[%c0_165, %c6_166, %c0_167] : memref<2x8x8xf32, #tpu.memory_space<vmem>>, vector<2x1x8xf32>
    %c6_168 = arith.constant 6 : index
    %c0_169 = arith.constant 0 : index
    %c0_170 = arith.constant 0 : index
    %200 = vector.load %arg4[%c6_168, %c0_169, %c0_170] : memref<8x8x8xf32, #tpu.memory_space<vmem>>, vector<1x8x8xf32>
    %201 = vector.shape_cast %200 : vector<1x8x8xf32> to vector<8x8xf32>
    %c6_171 = arith.constant 6 : index
    %c0_172 = arith.constant 0 : index
    %c0_173 = arith.constant 0 : index
    %202 = vector.load %arg5[%c6_171, %c0_172, %c0_173] : memref<8x8x8xf32, #tpu.memory_space<vmem>>, vector<1x8x8xf32>
    %203 = vector.shape_cast %202 : vector<1x8x8xf32> to vector<8x8xf32>
    %c0_174 = arith.constant 0 : index
    %c0_175 = arith.constant 0 : index
    %c0_176 = arith.constant 0 : index
    %204 = vector.load %arg12[%c0_174, %c0_175, %c0_176] : memref<2x8x8xf32, #tpu.memory_space<vmem>>, vector<2x8x8xf32>
    %205 = vector.shape_cast %201 : vector<8x8xf32> to vector<1x8x8xf32>
    %206 = vector.broadcast %198 : vector<2x1x8xf32> to vector<2x8x8xf32>
    %207 = vector.broadcast %205 : vector<1x8x8xf32> to vector<2x8x8xf32>
    %208 = arith.mulf %206, %207 : vector<2x8x8xf32>
    %209 = vector.shape_cast %203 : vector<8x8xf32> to vector<1x8x8xf32>
    %210 = vector.broadcast %199 : vector<2x1x8xf32> to vector<2x8x8xf32>
    %211 = vector.broadcast %209 : vector<1x8x8xf32> to vector<2x8x8xf32>
    %212 = arith.mulf %210, %211 : vector<2x8x8xf32>
    %213 = arith.subf %208, %212 : vector<2x8x8xf32>
    %214 = arith.addf %204, %213 : vector<2x8x8xf32>
    %c0_177 = arith.constant 0 : index
    %c0_178 = arith.constant 0 : index
    %c0_179 = arith.constant 0 : index
    %215 = vector.load %arg12[%c0_177, %c0_178, %c0_179] : memref<2x8x8xf32, #tpu.memory_space<vmem>>, vector<2x8x8xf32>
    tpu.vector_store %arg12[%c0_177, %c0_178, %c0_179], %214 {strides = array<i32>} : memref<2x8x8xf32, #tpu.memory_space<vmem>>, vector<2x8x8xf32>,
    %c0_180 = arith.constant 0 : index
    %c0_181 = arith.constant 0 : index
    %c0_182 = arith.constant 0 : index
    %216 = vector.load %arg13[%c0_180, %c0_181, %c0_182] : memref<2x8x8xf32, #tpu.memory_space<vmem>>, vector<2x8x8xf32>
    %217 = vector.shape_cast %203 : vector<8x8xf32> to vector<1x8x8xf32>
    %218 = vector.broadcast %198 : vector<2x1x8xf32> to vector<2x8x8xf32>
    %219 = vector.broadcast %217 : vector<1x8x8xf32> to vector<2x8x8xf32>
    %220 = arith.mulf %218, %219 : vector<2x8x8xf32>
    %221 = vector.shape_cast %201 : vector<8x8xf32> to vector<1x8x8xf32>
    %222 = vector.broadcast %199 : vector<2x1x8xf32> to vector<2x8x8xf32>
    %223 = vector.broadcast %221 : vector<1x8x8xf32> to vector<2x8x8xf32>
    %224 = arith.mulf %222, %223 : vector<2x8x8xf32>
    %225 = arith.addf %220, %224 : vector<2x8x8xf32>
    %226 = arith.addf %216, %225 : vector<2x8x8xf32>
    %c0_183 = arith.constant 0 : index
    %c0_184 = arith.constant 0 : index
    %c0_185 = arith.constant 0 : index
    %227 = vector.load %arg13[%c0_183, %c0_184, %c0_185] : memref<2x8x8xf32, #tpu.memory_space<vmem>>, vector<2x8x8xf32>
    tpu.vector_store %arg13[%c0_183, %c0_184, %c0_185], %226 {strides = array<i32>} : memref<2x8x8xf32, #tpu.memory_space<vmem>>, vector<2x8x8xf32>,
    %c0_186 = arith.constant 0 : index
    %c7 = arith.constant 7 : index
    %c0_187 = arith.constant 0 : index
    %228 = vector.load %arg10[%c0_186, %c7, %c0_187] : memref<2x8x8xf32, #tpu.memory_space<vmem>>, vector<2x1x8xf32>
    %c0_188 = arith.constant 0 : index
    %c7_189 = arith.constant 7 : index
    %c0_190 = arith.constant 0 : index
    %229 = vector.load %arg11[%c0_188, %c7_189, %c0_190] : memref<2x8x8xf32, #tpu.memory_space<vmem>>, vector<2x1x8xf32>
    %c7_191 = arith.constant 7 : index
    %c0_192 = arith.constant 0 : index
    %c0_193 = arith.constant 0 : index
    %230 = vector.load %arg4[%c7_191, %c0_192, %c0_193] : memref<8x8x8xf32, #tpu.memory_space<vmem>>, vector<1x8x8xf32>
    %231 = vector.shape_cast %230 : vector<1x8x8xf32> to vector<8x8xf32>
    %c7_194 = arith.constant 7 : index
    %c0_195 = arith.constant 0 : index
    %c0_196 = arith.constant 0 : index
    %232 = vector.load %arg5[%c7_194, %c0_195, %c0_196] : memref<8x8x8xf32, #tpu.memory_space<vmem>>, vector<1x8x8xf32>
    %233 = vector.shape_cast %232 : vector<1x8x8xf32> to vector<8x8xf32>
    %c0_197 = arith.constant 0 : index
    %c0_198 = arith.constant 0 : index
    %c0_199 = arith.constant 0 : index
    %234 = vector.load %arg12[%c0_197, %c0_198, %c0_199] : memref<2x8x8xf32, #tpu.memory_space<vmem>>, vector<2x8x8xf32>
    %235 = vector.shape_cast %231 : vector<8x8xf32> to vector<1x8x8xf32>
    %236 = vector.broadcast %228 : vector<2x1x8xf32> to vector<2x8x8xf32>
    %237 = vector.broadcast %235 : vector<1x8x8xf32> to vector<2x8x8xf32>
    %238 = arith.mulf %236, %237 : vector<2x8x8xf32>
    %239 = vector.shape_cast %233 : vector<8x8xf32> to vector<1x8x8xf32>
    %240 = vector.broadcast %229 : vector<2x1x8xf32> to vector<2x8x8xf32>
    %241 = vector.broadcast %239 : vector<1x8x8xf32> to vector<2x8x8xf32>
    %242 = arith.mulf %240, %241 : vector<2x8x8xf32>
    %243 = arith.subf %238, %242 : vector<2x8x8xf32>
    %244 = arith.addf %234, %243 : vector<2x8x8xf32>
    %c0_200 = arith.constant 0 : index
    %c0_201 = arith.constant 0 : index
    %c0_202 = arith.constant 0 : index
    %245 = vector.load %arg12[%c0_200, %c0_201, %c0_202] : memref<2x8x8xf32, #tpu.memory_space<vmem>>, vector<2x8x8xf32>
    tpu.vector_store %arg12[%c0_200, %c0_201, %c0_202], %244 {strides = array<i32>} : memref<2x8x8xf32, #tpu.memory_space<vmem>>, vector<2x8x8xf32>,
    %c0_203 = arith.constant 0 : index
    %c0_204 = arith.constant 0 : index
    %c0_205 = arith.constant 0 : index
    %246 = vector.load %arg13[%c0_203, %c0_204, %c0_205] : memref<2x8x8xf32, #tpu.memory_space<vmem>>, vector<2x8x8xf32>
    %247 = vector.shape_cast %233 : vector<8x8xf32> to vector<1x8x8xf32>
    %248 = vector.broadcast %228 : vector<2x1x8xf32> to vector<2x8x8xf32>
    %249 = vector.broadcast %247 : vector<1x8x8xf32> to vector<2x8x8xf32>
    %250 = arith.mulf %248, %249 : vector<2x8x8xf32>
    %251 = vector.shape_cast %231 : vector<8x8xf32> to vector<1x8x8xf32>
    %252 = vector.broadcast %229 : vector<2x1x8xf32> to vector<2x8x8xf32>
    %253 = vector.broadcast %251 : vector<1x8x8xf32> to vector<2x8x8xf32>
    %254 = arith.mulf %252, %253 : vector<2x8x8xf32>
    %255 = arith.addf %250, %254 : vector<2x8x8xf32>
    %256 = arith.addf %246, %255 : vector<2x8x8xf32>
    %c0_206 = arith.constant 0 : index
    %c0_207 = arith.constant 0 : index
    %c0_208 = arith.constant 0 : index
    %257 = vector.load %arg13[%c0_206, %c0_207, %c0_208] : memref<2x8x8xf32, #tpu.memory_space<vmem>>, vector<2x8x8xf32>
    tpu.vector_store %arg13[%c0_206, %c0_207, %c0_208], %256 {strides = array<i32>} : memref<2x8x8xf32, #tpu.memory_space<vmem>>, vector<2x8x8xf32>,
    %c0_209 = arith.constant 0 : index
    %c0_210 = arith.constant 0 : index
    %c0_211 = arith.constant 0 : index
    %258 = vector.load %arg12[%c0_209, %c0_210, %c0_211] : memref<2x8x8xf32, #tpu.memory_space<vmem>>, vector<2x8x8xf32>
    %259 = vector.shape_cast %258 : vector<2x8x8xf32> to vector<16x8xf32>
    %c0_212 = arith.constant 0 : index
    %c0_213 = arith.constant 0 : index
    %260 = vector.load %arg7[%c0_212, %c0_213] : memref<8x128xf32, #tpu.memory_space<vmem>>, vector<8x128xf32>
    %cst_214 = arith.constant dense<0.000000e+00> : vector<16x128xf32>
    %261 = tpu.matmul %259, %260, %cst_214 {dimension_numbers = #tpu.dot_dimension_numbers<[1], [0], [0], [1], [0, 0, 1, 1], [], []>} : vector<16x8xf32>, vector<8x128xf32>, vector<16x128xf32> -> vector<16x128xf32>
    %c0_215 = arith.constant 0 : index
    %c0_216 = arith.constant 0 : index
    %c0_217 = arith.constant 0 : index
    %262 = vector.load %arg13[%c0_215, %c0_216, %c0_217] : memref<2x8x8xf32, #tpu.memory_space<vmem>>, vector<2x8x8xf32>
    %263 = vector.shape_cast %262 : vector<2x8x8xf32> to vector<16x8xf32>
    %c0_218 = arith.constant 0 : index
    %c0_219 = arith.constant 0 : index
    %264 = vector.load %arg8[%c0_218, %c0_219] : memref<8x128xf32, #tpu.memory_space<vmem>>, vector<8x128xf32>
    %cst_220 = arith.constant dense<0.000000e+00> : vector<16x128xf32>
    %265 = tpu.matmul %263, %264, %cst_220 {dimension_numbers = #tpu.dot_dimension_numbers<[1], [0], [0], [1], [0, 0, 1, 1], [], []>} : vector<16x8xf32>, vector<8x128xf32>, vector<16x128xf32> -> vector<16x128xf32>
    %266 = arith.addf %261, %265 : vector<16x128xf32>
    %c0_221 = arith.constant 0 : index
    %c0_222 = arith.constant 0 : index
    %267 = vector.load %arg9[%c0_221, %c0_222] : memref<16x128xf32, #tpu.memory_space<vmem>>, vector<16x128xf32>
    tpu.vector_store %arg9[%c0_221, %c0_222], %266 {strides = array<i32>} : memref<16x128xf32, #tpu.memory_space<vmem>>, vector<16x128xf32>,
    return
  }
  func.func @transform_0(%arg0: i32) -> (i32, i32) {
    %c0_i32 = arith.constant 0 : i32
    %c0_i32_0 = arith.constant 0 : i32
    return %arg0, %c0_i32 : i32, i32
  }
  func.func @transform_1(%arg0: i32) -> (i32, i32) {
    %c0_i32 = arith.constant 0 : i32
    %c0_i32_0 = arith.constant 0 : i32
    %c0_i32_1 = arith.constant 0 : i32
    return %c0_i32, %c0_i32_0 : i32, i32
  }
  func.func @transform_2(%arg0: i32) -> (i32, i32) {
    %c0_i32 = arith.constant 0 : i32
    %c0_i32_0 = arith.constant 0 : i32
    %c0_i32_1 = arith.constant 0 : i32
    return %c0_i32, %c0_i32_0 : i32, i32
  }
  func.func @transform_3(%arg0: i32) -> (i32, i32, i32) {
    %c0_i32 = arith.constant 0 : i32
    %c0_i32_0 = arith.constant 0 : i32
    %c0_i32_1 = arith.constant 0 : i32
    %c0_i32_2 = arith.constant 0 : i32
    return %c0_i32, %c0_i32_0, %c0_i32_1 : i32, i32, i32
  }
  func.func @transform_4(%arg0: i32) -> (i32, i32, i32) {
    %c0_i32 = arith.constant 0 : i32
    %c0_i32_0 = arith.constant 0 : i32
    %c0_i32_1 = arith.constant 0 : i32
    %c0_i32_2 = arith.constant 0 : i32
    return %c0_i32, %c0_i32_0, %c0_i32_1 : i32, i32, i32
  }
  func.func @transform_5(%arg0: i32) -> (i32, i32) {
    %c0_i32 = arith.constant 0 : i32
    %c0_i32_0 = arith.constant 0 : i32
    %c0_i32_1 = arith.constant 0 : i32
    return %c0_i32, %c0_i32_0 : i32, i32
  }
  func.func @transform_6(%arg0: i32) -> (i32, i32) {
    %c0_i32 = arith.constant 0 : i32
    %c0_i32_0 = arith.constant 0 : i32
    %c0_i32_1 = arith.constant 0 : i32
    return %c0_i32, %c0_i32_0 : i32, i32
  }
  func.func @transform_7(%arg0: i32) -> (i32, i32) {
    %c0_i32 = arith.constant 0 : i32
    %c0_i32_0 = arith.constant 0 : i32
    %c0_i32_1 = arith.constant 0 : i32
    return %c0_i32, %c0_i32_0 : i32, i32
  }
  func.func @transform_8(%arg0: i32) -> (i32, i32) {
    %c0_i32 = arith.constant 0 : i32
    %c0_i32_0 = arith.constant 0 : i32
    return %arg0, %c0_i32 : i32, i32
  }
}

</mosaic_0001>

<bundles_post_ra>
// kernel: tpu_custom_call.1
= control target key start
LH: loop header
LB: loop body
LE: loop exit
PB: predicated region body
PF: predicated region fallthrough
CT: control target
= control target key end

     0   :  { %13 = vsyncpa [#allocation7], 0  ;;  %s836_s0 = inlined_call_operand.vmem [shape: f32[16,16], index: 0, kind: input, shape index: {}]   ;;  %s837_s1 = inlined_call_operand.vmem [shape: f32[16,8], index: 1, kind: input, shape index: {}]   ;;  %s838_s2 = inlined_call_operand.vmem [shape: f32[16,8], index: 2, kind: input, shape index: {}]   ;;  %s839_s3 = inlined_call_operand.hbm [shape: f32[8,8,8], index: 3, kind: input, shape index: {}]   ;;  %s840_s4 = inlined_call_operand.hbm [shape: f32[8,8,8], index: 4, kind: input, shape index: {}]   ;;  %s841_s5 = inlined_call_operand.vmem [shape: f32[8,8], index: 5, kind: input, shape index: {}]   ;;  %s842_s6 = inlined_call_operand.vmem [shape: f32[8,128], index: 6, kind: input, shape index: {}]   ;;  %s843_s7 = inlined_call_operand.vmem [shape: f32[8,128], index: 7, kind: input, shape index: {}]   ;;  %s844_s8 = inlined_call_operand.hbm [shape: f32[16,128], index: 8, kind: output, shape index: {}]  }
   0x1   :  { %14 = vsyncpa [#allocation10], 0 }
   0x2   :  { %15 = vsyncpa [#allocation8], 0  ;;  %s26_s29 = sshll.u32 %s839_s3, 4  ;;  %s636_s30 = smov [#allocation6]   ;;  %s27_s29 = int_to_ptr.hbm [resolvable:$true] %s26_s29 }
   0x3   :  { %s28_s9 = sshll.u32 %s636_s30, 4  ;;  %s39_s12 = sshll.u32 %s840_s4, 4  ;;  %s29_s9 = int_to_ptr.vmem [resolvable:$true] %s28_s9  ;;  %s40_s12 = int_to_ptr.hbm [resolvable:$true] %s39_s12 }
   0x4   :  { %s637_s13 = smov 128   ;;  %s638_s14 = smov 8  }
   0x5   :  { %34 = dma.hbm_to_vmem [thread:$0]  %s27_s29, 1024, %s29_s9, [#allocation7], %s637_s13, %s637_s13, %s638_s14  }
   0x6   :  { %s639_s15 = smov [#allocation9]  }
   0x7   :  { %s41_s16 = sshll.u32 %s639_s15, 4  ;;  %s42_s16 = int_to_ptr.vmem [resolvable:$true] %s41_s16 }
   0x8   :  { %47 = dma.hbm_to_vmem [thread:$0]  %s40_s12, 1024, %s42_s16, [#allocation10], %s637_s13, %s637_s13, %s638_s14  }
   0x9   :  { %630 = dma.done.wait [#allocation7], 1024  }
   0xa   :  { %631 = vsyncadd [#allocation7], 4294966272 }
   0xb   :  { %632 = dma.done.wait [#allocation10], 1024  }
   0xc   :  { %633 = vsyncadd [#allocation10], 4294966272  ;;  %v65_v0 = vld [vmem:[%s837_s1 + $0x8] sm:$0xff]  ;;  %v64_v2 = vld [vmem:[%s837_s1] sm:$0xff]  ;;  %vm66_vm0 = vcmask 130048   ;;  %vm96_vm1 = vcmask 64512  }
   0xd   :  { %v102_v1 = vld [vmem:[%s838_s2 + $0x8] sm:$0xff]  ;;  %87 = vmatpush.msra.mxu0 %v65_v0  ;;  %v101_v3 = vld [vmem:[%s838_s2] sm:$0xff]  ;;  %v640_v7 = vmov 0.0   ;;  %v730_v42 = vld [vmem:[#allocation6 + $0x10] sm:$0xff]  ;;  %s498_s9 = sshll.u32 %s844_s8, 4  ;;  %s499_s9 = int_to_ptr.hbm [resolvable:$true] %s498_s9 }
   0xe   :  { %123 = vmatpush.msra.mxu1 %v102_v1  ;;  %v62_v4 = vld [vmem:[%s836_s0] sm:$0xff]  ;;  %v63_v5 = vld [vmem:[%s836_s0 + $0x8] sm:$0xff]  ;;  %138 = vst.msk [vmem:[#allocation5] sm:$0xff] %vm96_vm1, %v640_v7  ;;  %v732_v43 = vld [vmem:[#allocation9 + $0x10] sm:$0xff] }
   0xf   :  { %88 = vmatpush.msra.mxu0 %v64_v2  ;;  %v134_v6 = vld [vmem:[%s841_s5] sm:$0xff]  ;;  %139 = vst.msk [vmem:[#allocation5 + $0x8] sm:$0xff] %vm96_vm1, %v640_v7  ;;  %v179_v28 = vld [vmem:[#allocation6 + $0x8] sm:$0xff] }
  0x10   :  { %124 = vmatpush.msra.mxu1 %v101_v3  ;;  %512 = vmatmul.msk.f32.vlgmr.msra.gmra.mxu0 %vm66_vm0, %v62_v4  ;;  %136 = vst.msk [vmem:[#allocation4] sm:$0xff] %vm96_vm1, %v134_v6  ;;  %v144_v10 = vld [vmem:[#allocation6] sm:$0xff]  ;;  %v181_v29 = vld [vmem:[#allocation9 + $0x8] sm:$0xff] }
  0x11   :  { %514 = vmatmul.msk.f32.vlgmr.msra.gmra.mxu1 %vm66_vm0, %v62_v4  ;;  %137 = vst.msk [vmem:[#allocation4 + $0x8] sm:$0xff] %vm96_vm1, %v134_v6  ;;  %v145_v12 = vld [vmem:[#allocation9] sm:$0xff]  ;;  %v743_v6 = vld [vmem:[#allocation9 + $0x18] sm:$0xff] }
  0x15   :  { %v162_v20 = vld [vmem:[#allocation5] sm:$0xff] }
  0x16   :  { %v163_v55 = vld [vmem:[#allocation5 + $0x8] sm:$0xff] }
  0x17   :  { %v146_v16 = vld [vmem:[#allocation4] sm:$0xff] }
  0x18   :  { %513 = vmatmul.msk.f32.gmra.mxu0 %vm66_vm0, %v63_v5  ;;  %v147_v54 = vld [vmem:[#allocation4 + $0x8] sm:$0xff] }
  0x19   :  { %515 = vmatmul.msk.f32.gmra.mxu1 %vm66_vm0, %v63_v5  ;;  %v741_v5 = vld [vmem:[#allocation6 + $0x18] sm:$0xff] }
  0x8d   :  { %v90_v8 = vpop.f32.mrf.mxu0 }
  0x8e   :  { %v126_v9 = vpop.f32.mrf.mxu1  ;;  %97 = vst.msk [vmem:[#allocation2] sm:$0xff] %vm96_vm1, %v90_v8 }
  0x8f   :  { %132 = vst.msk [vmem:[#allocation3] sm:$0xff] %vm96_vm1, %v126_v9 }
  0x95   :  { %v526_v11 = vld [vmem:[#allocation2] ss:$0 sm:$0xff]  ;;  %v93_v19 = vpop.f32.mrf.mxu0  ;;  %v527_v24 = vld [vmem:[#allocation2 + $0x1] ss:$0 sm:$0xff]  ;;  %v528_v36 = vld [vmem:[#allocation2 + $0x2] ss:$0 sm:$0xff] }
  0x96   :  { %v150_v13 = vmul.f32 %v526_v11, %v144_v10  ;;  %v164_v14 = vmul.f32 %v526_v11, %v145_v12  ;;  %v534_v15 = vld [vmem:[#allocation3] ss:$0 sm:$0xff]  ;;  %v129_v21 = vpop.f32.mrf.mxu1  ;;  %98 = vst.msk [vmem:[#allocation2 + $0x8] sm:$0xff] %vm96_vm1, %v93_v19  ;;  %v535_v27 = vld [vmem:[#allocation3 + $0x1] ss:$0 sm:$0xff]  ;;  %v186_v30 = vmul.f32 %v527_v24, %v179_v28  ;;  %v200_v32 = vmul.f32 %v527_v24, %v181_v29 }
  0x97   :  { %v154_v17 = vmul.f32 %v534_v15, %v145_v12  ;;  %v166_v18 = vmul.f32 %v534_v15, %v144_v10  ;;  %133 = vst.msk [vmem:[#allocation3 + $0x8] sm:$0xff] %vm96_vm1, %v129_v21  ;;  %v190_v31 = vmul.f32 %v535_v27, %v181_v29  ;;  %v202_v33 = vmul.f32 %v535_v27, %v179_v28  ;;  %v536_v41 = vld [vmem:[#allocation3 + $0x2] ss:$0 sm:$0xff]  ;;  %v529_v1 = vld [vmem:[#allocation2 + $0x3] ss:$0 sm:$0xff] }
  0x98   :  { %v222_v48 = vmul.f32 %v528_v36, %v730_v42  ;;  %v226_v49 = vmul.f32 %v536_v41, %v732_v43  ;;  %v236_v52 = vmul.f32 %v528_v36, %v732_v43  ;;  %v238_v53 = vmul.f32 %v536_v41, %v730_v42  ;;  %v537_v4 = vld [vmem:[#allocation3 + $0x3] ss:$0 sm:$0xff]  ;;  %v530_v27 = vld [vmem:[#allocation2 + $0x4] ss:$0 sm:$0xff] }
  0x99   :  { %v156_v22 = vsub.f32 %v150_v13, %v154_v17  ;;  %v168_v23 = vadd.f32 %v166_v18, %v164_v14  ;;  %v192_v34 = vsub.f32 %v186_v30, %v190_v31  ;;  %v204_v38 = vadd.f32 %v202_v33, %v200_v32  ;;  %v538_v30 = vld [vmem:[#allocation3 + $0x4] ss:$0 sm:$0xff]  ;;  %v753_v31 = vld [vmem:[#allocation6 + $0x20] sm:$0xff] }
  0x9a   :  { %v228_v58 = vsub.f32 %v222_v48, %v226_v49  ;;  %v240_v0 = vadd.f32 %v238_v53, %v236_v52  ;;  %v262_v13 = vmul.f32 %v537_v4, %v743_v6  ;;  %v272_v14 = vmul.f32 %v529_v1, %v743_v6  ;;  %v755_v32 = vld [vmem:[#allocation9 + $0x20] sm:$0xff] }
  0x9b   :  { %v158_v25 = vadd.f32 %v156_v22, %v146_v16  ;;  %v170_v26 = vadd.f32 %v168_v23, %v162_v20  ;;  %v274_v15 = vmul.f32 %v537_v4, %v741_v5  ;;  %v310_v41 = vmul.f32 %v538_v30, %v753_v31 }
  0x9d   :  { %160 = vst.msk [vmem:[#allocation4] sm:$0xff] %vm96_vm1, %v158_v25  ;;  %v542_v35 = vld [vmem:[#allocation2 + $0x8] ss:$0 sm:$0xff]  ;;  %v543_v59 = vld [vmem:[#allocation2 + $0x9] ss:$0 sm:$0xff]  ;;  %v276_v25 = vadd.f32 %v274_v15, %v272_v14 }
  0x9e   :  { %172 = vst.msk [vmem:[#allocation5] sm:$0xff] %vm96_vm1, %v170_v26  ;;  %v151_v45 = vmul.f32 %v542_v35, %v144_v10  ;;  %v165_v46 = vmul.f32 %v542_v35, %v145_v12  ;;  %v550_v47 = vld [vmem:[#allocation3 + $0x8] ss:$0 sm:$0xff]  ;;  %v551_v62 = vld [vmem:[#allocation3 + $0x9] ss:$0 sm:$0xff]  ;;  %v187_v8 = vmul.f32 %v543_v59, %v179_v28 }
  0x9f   :  { %v155_v50 = vmul.f32 %v550_v47, %v145_v12  ;;  %v167_v51 = vmul.f32 %v550_v47, %v144_v10  ;;  %v191_v9 = vmul.f32 %v551_v62, %v181_v29  ;;  %v201_v10 = vmul.f32 %v543_v59, %v181_v29  ;;  %v544_v20 = vld [vmem:[#allocation2 + $0xa] ss:$0 sm:$0xff]  ;;  %v552_v23 = vld [vmem:[#allocation3 + $0xa] ss:$0 sm:$0xff]  ;;  %v545_v48 = vld [vmem:[#allocation2 + $0xb] ss:$0 sm:$0xff] }
  0xa0   :  { %v203_v11 = vmul.f32 %v551_v62, %v179_v28  ;;  %v258_v12 = vmul.f32 %v529_v1, %v741_v5  ;;  %v227_v35 = vmul.f32 %v552_v23, %v732_v43  ;;  %v237_v36 = vmul.f32 %v544_v20, %v732_v43 }
  0xa1   :  { %v157_v56 = vsub.f32 %v151_v45, %v155_v50  ;;  %v169_v57 = vadd.f32 %v167_v51, %v165_v46  ;;  %v193_v16 = vsub.f32 %v187_v8, %v191_v9  ;;  %v553_v51 = vld [vmem:[#allocation3 + $0xb] ss:$0 sm:$0xff]  ;;  %v273_v62 = vmul.f32 %v545_v48, %v743_v6 }
  0xa2   :  { %v205_v18 = vadd.f32 %v203_v11, %v201_v10  ;;  %v264_v19 = vsub.f32 %v258_v12, %v262_v13  ;;  %v546_v10 = vld [vmem:[#allocation2 + $0xc] ss:$0 sm:$0xff]  ;;  %v554_v13 = vld [vmem:[#allocation3 + $0xc] ss:$0 sm:$0xff] }
  0xa3   :  { %v159_v60 = vadd.f32 %v157_v56, %v147_v54  ;;  %v171_v61 = vadd.f32 %v169_v57, %v163_v55  ;;  %v539_v56 = vld [vmem:[#allocation3 + $0x5] ss:$0 sm:$0xff]  ;;  %v769_v57 = vld [vmem:[#allocation6 + $0x28] sm:$0xff] }
  0xa4   :  { %v182_v37 = vld [vmem:[#allocation4] sm:$0xff] }
  0xa5   :  { %v194_v39 = vadd.f32 %v192_v34, %v182_v37  ;;  %v198_v40 = vld [vmem:[#allocation5] sm:$0xff]  ;;  %161 = vst.msk [vmem:[#allocation4 + $0x8] sm:$0xff] %vm96_vm1, %v159_v60  ;;  %v223_v34 = vmul.f32 %v544_v20, %v730_v42  ;;  %v239_v37 = vmul.f32 %v552_v23, %v730_v42  ;;  %v531_v42 = vld [vmem:[#allocation2 + $0x5] ss:$0 sm:$0xff]  ;;  %v259_v60 = vmul.f32 %v545_v48, %v741_v5 }
  0xa6   :  { %v206_v44 = vadd.f32 %v204_v38, %v198_v40  ;;  %173 = vst.msk [vmem:[#allocation5 + $0x8] sm:$0xff] %vm96_vm1, %v171_v61  ;;  %v294_v38 = vmul.f32 %v530_v27, %v753_v31  ;;  %v308_v40 = vmul.f32 %v530_v27, %v755_v32  ;;  %v263_v61 = vmul.f32 %v553_v51, %v743_v6  ;;  %v787_v20 = vld [vmem:[#allocation9 + $0x30] sm:$0xff] }
  0xa7   :  { %196 = vst.msk [vmem:[#allocation4] sm:$0xff] %vm96_vm1, %v194_v39  ;;  %v298_v39 = vmul.f32 %v538_v30, %v755_v32  ;;  %v241_v46 = vadd.f32 %v239_v37, %v237_v36  ;;  %v299_v23 = vmul.f32 %v554_v13, %v755_v32  ;;  %v547_v36 = vld [vmem:[#allocation2 + $0xd] ss:$0 sm:$0xff]  ;;  %v541_v48 = vld [vmem:[#allocation3 + $0x7] ss:$0 sm:$0xff] }
  0xa8   :  { %208 = vst.msk [vmem:[#allocation5] sm:$0xff] %vm96_vm1, %v206_v44  ;;  %v229_v44 = vsub.f32 %v223_v34, %v227_v35  ;;  %v312_v43 = vadd.f32 %v310_v41, %v308_v40  ;;  %v265_v4 = vsub.f32 %v259_v60, %v263_v61 }
  0xa9   :  { %v300_v47 = vsub.f32 %v294_v38, %v298_v39  ;;  %v555_v39 = vld [vmem:[#allocation3 + $0xd] ss:$0 sm:$0xff] }
  0xac   :  { %v183_v17 = vld [vmem:[#allocation4 + $0x8] sm:$0xff] }
  0xad   :  { %v195_v21 = vadd.f32 %v193_v16, %v183_v17  ;;  %v199_v22 = vld [vmem:[#allocation5 + $0x8] sm:$0xff] }
  0xae   :  { %v218_v63 = vld [vmem:[#allocation4] sm:$0xff]  ;;  %v207_v26 = vadd.f32 %v205_v18, %v199_v22  ;;  %v540_v18 = vld [vmem:[#allocation3 + $0x6] ss:$0 sm:$0xff]  ;;  %v295_v22 = vmul.f32 %v546_v10, %v753_v31 }
  0xaf   :  { %v230_v2 = vadd.f32 %v228_v58, %v218_v63  ;;  %v234_v3 = vld [vmem:[#allocation5] sm:$0xff]  ;;  %197 = vst.msk [vmem:[#allocation4 + $0x8] sm:$0xff] %vm96_vm1, %v195_v21  ;;  %v771_v58 = vld [vmem:[#allocation9 + $0x28] sm:$0xff]  ;;  %v275_v63 = vmul.f32 %v553_v51, %v741_v5  ;;  %v532_v5 = vld [vmem:[#allocation2 + $0x6] ss:$0 sm:$0xff]  ;;  %v370_v27 = vmul.f32 %v540_v18, %v787_v20 }
  0xb0   :  { %v242_v7 = vadd.f32 %v240_v0, %v234_v3  ;;  %209 = vst.msk [vmem:[#allocation5 + $0x8] sm:$0xff] %vm96_vm1, %v207_v26  ;;  %v330_v0 = vmul.f32 %v531_v42, %v769_v57  ;;  %v334_v1 = vmul.f32 %v539_v56, %v771_v58  ;;  %v346_v3 = vmul.f32 %v539_v56, %v769_v57 }
  0xb1   :  { %232 = vst.msk [vmem:[#allocation4] sm:$0xff] %vm96_vm1, %v230_v2  ;;  %v344_v2 = vmul.f32 %v531_v42, %v771_v58  ;;  %v277_v8 = vadd.f32 %v275_v63, %v273_v62  ;;  %v301_v30 = vsub.f32 %v295_v22, %v299_v23  ;;  %v347_v42 = vmul.f32 %v555_v39, %v769_v57 }
  0xb2   :  { %244 = vst.msk [vmem:[#allocation5] sm:$0xff] %vm96_vm1, %v242_v7  ;;  %v336_v9 = vsub.f32 %v330_v0, %v334_v1  ;;  %v548_v0 = vld [vmem:[#allocation2 + $0xe] ss:$0 sm:$0xff] }
  0xb3   :  { %v348_v6 = vadd.f32 %v346_v3, %v344_v2  ;;  %v556_v3 = vld [vmem:[#allocation3 + $0xe] ss:$0 sm:$0xff] }
  0xb6   :  { %v219_v45 = vld [vmem:[#allocation4 + $0x8] sm:$0xff] }
  0xb7   :  { %v231_v49 = vadd.f32 %v229_v44, %v219_v45  ;;  %v235_v50 = vld [vmem:[#allocation5 + $0x8] sm:$0xff]  ;;  %v428_v44 = vld [vmem:[%s842_s6] sm:$0xff]  ;;  %s641_s6 = smov [#allocation11]  }
  0xb8   :  { %v254_v24 = vld [vmem:[#allocation4] sm:$0xff]  ;;  %v243_v53 = vadd.f32 %v241_v46, %v235_v50  ;;  %482 = vmatpush.msra.mxu3 %v428_v44  ;;  %v397_v50 = vld [vmem:[#allocation9 + $0x38] sm:$0xff] }
  0xb9   :  { %v266_v28 = vadd.f32 %v264_v19, %v254_v24  ;;  %v270_v29 = vld [vmem:[#allocation5] sm:$0xff]  ;;  %233 = vst.msk [vmem:[#allocation4 + $0x8] sm:$0xff] %vm96_vm1, %v231_v49  ;;  %v309_v24 = vmul.f32 %v546_v10, %v755_v32  ;;  %v533_v45 = vld [vmem:[#allocation2 + $0x7] ss:$0 sm:$0xff]  ;;  %v395_v49 = vld [vmem:[#allocation6 + $0x38] sm:$0xff] }
  0xba   :  { %v278_v33 = vadd.f32 %v276_v25, %v270_v29  ;;  %245 = vst.msk [vmem:[#allocation5 + $0x8] sm:$0xff] %vm96_vm1, %v243_v53  ;;  %v785_v19 = vld [vmem:[#allocation6 + $0x30] sm:$0xff]  ;;  %v311_v25 = vmul.f32 %v554_v13, %v753_v31  ;;  %v431_v31 = vld [vmem:[%s843_s7] sm:$0xff]  ;;  %v345_v53 = vmul.f32 %v547_v36, %v771_v58  ;;  %v416_v56 = vmul.f32 %v533_v45, %v397_v50  ;;  %s496_s7 = sshll.u32 %s641_s6, 4  ;;  %s497_s7 = int_to_ptr.vmem [resolvable:$true] %s496_s7 }
  0xbb   :  { %268 = vst.msk [vmem:[#allocation4] sm:$0xff] %vm96_vm1, %v266_v28  ;;  %v366_v26 = vmul.f32 %v532_v5, %v785_v19  ;;  %v380_v28 = vmul.f32 %v532_v5, %v787_v20  ;;  %v382_v29 = vmul.f32 %v540_v18, %v785_v19  ;;  %453 = vmatpush.msra.mxu2 %v431_v31  ;;  %v549_v5 = vld [vmem:[#allocation2 + $0xf] ss:$0 sm:$0xff]  ;;  %v557_v18 = vld [vmem:[#allocation3 + $0xf] ss:$0 sm:$0xff] }
  0xbc   :  { %280 = vst.msk [vmem:[#allocation5] sm:$0xff] %vm96_vm1, %v278_v33  ;;  %v313_v34 = vadd.f32 %v311_v25, %v309_v24  ;;  %v349_v62 = vadd.f32 %v347_v42, %v345_v53  ;;  %v383_v13 = vmul.f32 %v556_v3, %v785_v19  ;;  %v417_v24 = vmul.f32 %v549_v5, %v397_v50 }
  0xbd   :  { %v372_v35 = vsub.f32 %v366_v26, %v370_v27  ;;  %v384_v32 = vadd.f32 %v382_v29, %v380_v28  ;;  %v419_v25 = vmul.f32 %v557_v18, %v395_v49 }
  0xbf   :  { %v421_v28 = vadd.f32 %v419_v25, %v417_v24 }
  0xc0   :  { %v255_v7 = vld [vmem:[#allocation4 + $0x8] sm:$0xff] }
  0xc1   :  { %v267_v11 = vadd.f32 %v265_v4, %v255_v7  ;;  %v271_v12 = vld [vmem:[#allocation5 + $0x8] sm:$0xff] }
  0xc2   :  { %v290_v52 = vld [vmem:[#allocation4] sm:$0xff]  ;;  %v279_v15 = vadd.f32 %v277_v8, %v271_v12  ;;  %v381_v12 = vmul.f32 %v548_v0, %v787_v20 }
  0xc3   :  { %v302_v54 = vadd.f32 %v300_v47, %v290_v52  ;;  %v306_v55 = vld [vmem:[#allocation5] sm:$0xff]  ;;  %269 = vst.msk [vmem:[#allocation4 + $0x8] sm:$0xff] %vm96_vm1, %v267_v11  ;;  %v331_v52 = vmul.f32 %v547_v36, %v769_v57  ;;  %v371_v11 = vmul.f32 %v556_v3, %v787_v20  ;;  %v403_v20 = vmul.f32 %v549_v5, %v395_v49 }
  0xc4   :  { %v314_v59 = vadd.f32 %v312_v43, %v306_v55  ;;  %281 = vst.msk [vmem:[#allocation5 + $0x8] sm:$0xff] %vm96_vm1, %v279_v15  ;;  %v335_v43 = vmul.f32 %v555_v39, %v771_v58  ;;  %v406_v55 = vmul.f32 %v541_v48, %v397_v50  ;;  %v367_v58 = vmul.f32 %v548_v0, %v785_v19 }
  0xc5   :  { %304 = vst.msk [vmem:[#allocation4] sm:$0xff] %vm96_vm1, %v302_v54  ;;  %v402_v54 = vmul.f32 %v533_v45, %v395_v49  ;;  %v385_v15 = vadd.f32 %v383_v13, %v381_v12  ;;  %v407_v19 = vmul.f32 %v557_v18, %v397_v50 }
  0xc6   :  { %316 = vst.msk [vmem:[#allocation5] sm:$0xff] %vm96_vm1, %v314_v59  ;;  %v418_v59 = vmul.f32 %v541_v48, %v395_v49  ;;  %v337_v60 = vsub.f32 %v331_v52, %v335_v43 }
  0xc7   :  { %v408_v63 = vsub.f32 %v402_v54, %v406_v55  ;;  %v409_v26 = vsub.f32 %v403_v20, %v407_v19 }
  0xc8   :  { %v420_v7 = vadd.f32 %v418_v59, %v416_v56 }
  0xca   :  { %v291_v33 = vld [vmem:[#allocation4 + $0x8] sm:$0xff] }
  0xcb   :  { %v303_v37 = vadd.f32 %v301_v30, %v291_v33  ;;  %v307_v38 = vld [vmem:[#allocation5 + $0x8] sm:$0xff] }
  0xcc   :  { %v326_v14 = vld [vmem:[#allocation4] sm:$0xff]  ;;  %v315_v41 = vadd.f32 %v313_v34, %v307_v38 }
  0xcd   :  { %v338_v16 = vadd.f32 %v336_v9, %v326_v14  ;;  %v342_v17 = vld [vmem:[#allocation5] sm:$0xff]  ;;  %305 = vst.msk [vmem:[#allocation4 + $0x8] sm:$0xff] %vm96_vm1, %v303_v37  ;;  %v373_v14 = vsub.f32 %v367_v58, %v371_v11 }
  0xce   :  { %v350_v21 = vadd.f32 %v348_v6, %v342_v17  ;;  %317 = vst.msk [vmem:[#allocation5 + $0x8] sm:$0xff] %vm96_vm1, %v315_v41 }
  0xcf   :  { %340 = vst.msk [vmem:[#allocation4] sm:$0xff] %vm96_vm1, %v338_v16 }
  0xd0   :  { %352 = vst.msk [vmem:[#allocation5] sm:$0xff] %vm96_vm1, %v350_v21 }
  0xd4   :  { %v327_v61 = vld [vmem:[#allocation4 + $0x8] sm:$0xff] }
  0xd5   :  { %v339_v1 = vadd.f32 %v337_v60, %v327_v61  ;;  %v343_v2 = vld [vmem:[#allocation5 + $0x8] sm:$0xff] }
  0xd6   :  { %v362_v40 = vld [vmem:[#allocation4] sm:$0xff]  ;;  %v351_v8 = vadd.f32 %v349_v62, %v343_v2 }
  0xd7   :  { %v374_v46 = vadd.f32 %v372_v35, %v362_v40  ;;  %v378_v47 = vld [vmem:[#allocation5] sm:$0xff]  ;;  %341 = vst.msk [vmem:[#allocation4 + $0x8] sm:$0xff] %vm96_vm1, %v339_v1 }
  0xd8   :  { %v386_v51 = vadd.f32 %v384_v32, %v378_v47  ;;  %353 = vst.msk [vmem:[#allocation5 + $0x8] sm:$0xff] %vm96_vm1, %v351_v8 }
  0xd9   :  { %376 = vst.msk [vmem:[#allocation4] sm:$0xff] %vm96_vm1, %v374_v46 }
  0xda   :  { %388 = vst.msk [vmem:[#allocation5] sm:$0xff] %vm96_vm1, %v386_v51 }
  0xde   :  { %v363_v6 = vld [vmem:[#allocation4 + $0x8] sm:$0xff] }
  0xdf   :  { %v375_v16 = vadd.f32 %v373_v14, %v363_v6  ;;  %v379_v17 = vld [vmem:[#allocation5 + $0x8] sm:$0xff] }
  0xe0   :  { %v398_v4 = vld [vmem:[#allocation4] sm:$0xff]  ;;  %v387_v21 = vadd.f32 %v385_v15, %v379_v17 }
  0xe1   :  { %v410_v9 = vadd.f32 %v408_v63, %v398_v4  ;;  %v414_v10 = vld [vmem:[#allocation5] sm:$0xff]  ;;  %377 = vst.msk [vmem:[#allocation4 + $0x8] sm:$0xff] %vm96_vm1, %v375_v16 }
  0xe2   :  { %v422_v57 = vadd.f32 %v420_v7, %v414_v10  ;;  %389 = vst.msk [vmem:[#allocation5 + $0x8] sm:$0xff] %vm96_vm1, %v387_v21 }
  0xe3   :  { %412 = vst.msk [vmem:[#allocation4] sm:$0xff] %vm96_vm1, %v410_v9 }
  0xe4   :  { %424 = vst.msk [vmem:[#allocation5] sm:$0xff] %vm96_vm1, %v422_v57 }
  0xe8   :  { %v399_v27 = vld [vmem:[#allocation4 + $0x8] sm:$0xff] }
  0xe9   :  { %v411_v29 = vadd.f32 %v409_v26, %v399_v27  ;;  %v415_v30 = vld [vmem:[#allocation5 + $0x8] sm:$0xff] }
  0xea   :  { %v426_v22 = vld [vmem:[#allocation4] sm:$0xff]  ;;  %v423_v33 = vadd.f32 %v421_v28, %v415_v30 }
  0xeb   :  { %v429_v23 = vld [vmem:[#allocation5] sm:$0xff]  ;;  %518 = vmatmul.msk.f32.vlgmr.msra.gmra.mxu3 %vm96_vm1, %v426_v22  ;;  %413 = vst.msk [vmem:[#allocation4 + $0x8] sm:$0xff] %vm96_vm1, %v411_v29 }
  0xec   :  { %516 = vmatmul.msk.f32.vlgmr.msra.gmra.mxu2 %vm96_vm1, %v429_v23  ;;  %425 = vst.msk [vmem:[#allocation5 + $0x8] sm:$0xff] %vm96_vm1, %v423_v33 }
  0xf2   :  { %v427_v34 = vld [vmem:[#allocation4 + $0x8] sm:$0xff] }
  0xf3   :  { %v430_v35 = vld [vmem:[#allocation5 + $0x8] sm:$0xff]  ;;  %519 = vmatmul.msk.f32.gmra.mxu3 %vm96_vm1, %v427_v34 }
  0xf4   :  { %517 = vmatmul.msk.f32.gmra.mxu2 %vm96_vm1, %v430_v35 }
 0x16e   :  { %v484_v36 = vpop.f32.mrf.mxu3 }
 0x16f   :  { %v455_v37 = vpop.f32.mrf.mxu2 }
 0x170   :  { %v485_v38 = vadd.f32 %v484_v36, %v455_v37 }
 0x172   :  { %490 = vst [vmem:[#allocation11] sm:$0xff] %v485_v38 }
 0x176   :  { %v487_v39 = vpop.f32.mrf.mxu3 }
 0x177   :  { %v458_v40 = vpop.f32.mrf.mxu2 }
 0x178   :  { %v488_v32 = vadd.f32 %v487_v39, %v458_v40 }
 0x17a   :  { %491 = vst [vmem:[#allocation11 + $0x8] sm:$0xff] %v488_v32 }
 0x17b   :  { %504 = dma.vmem_to_hbm [thread:$0]  %s497_s7, 256, %s499_s9, [#allocation8], %s637_s13, %s637_s13, %s638_s14  }
 0x17c   :  { %634 = dma.done.wait [#allocation8], 256  }
 0x17d   :  { %635 = vsyncadd [#allocation8], 4294967040 }
 0x17e   :  { %509 = vsyncpa [#allocation7], 1 }
 0x17f   :  { %510 = vsyncpa [#allocation10], 1 }
 0x180   :  { %511 = vsyncpa [#allocation8], 1 }

// kernel: tpu_custom_call.1
= control target key start
LH: loop header
LB: loop body
LE: loop exit
PB: predicated region body
PF: predicated region fallthrough
CT: control target
= control target key end

     0   :  { %13 = vsyncpa [#allocation7], 0  ;;  %s836_s0 = inlined_call_operand.vmem [shape: f32[16,16], index: 0, kind: input, shape index: {}]   ;;  %s837_s1 = inlined_call_operand.vmem [shape: f32[16,8], index: 1, kind: input, shape index: {}]   ;;  %s838_s2 = inlined_call_operand.vmem [shape: f32[16,8], index: 2, kind: input, shape index: {}]   ;;  %s839_s3 = inlined_call_operand.hbm [shape: f32[8,8,8], index: 3, kind: input, shape index: {}]   ;;  %s840_s4 = inlined_call_operand.hbm [shape: f32[8,8,8], index: 4, kind: input, shape index: {}]   ;;  %s841_s5 = inlined_call_operand.vmem [shape: f32[8,8], index: 5, kind: input, shape index: {}]   ;;  %s842_s6 = inlined_call_operand.vmem [shape: f32[8,128], index: 6, kind: input, shape index: {}]   ;;  %s843_s7 = inlined_call_operand.vmem [shape: f32[8,128], index: 7, kind: input, shape index: {}]   ;;  %s844_s8 = inlined_call_operand.hbm [shape: f32[16,128], index: 8, kind: output, shape index: {}]  }
   0x1   :  { %14 = vsyncpa [#allocation10], 0 }
   0x2   :  { %15 = vsyncpa [#allocation8], 0  ;;  %s26_s29 = sshll.u32 %s839_s3, 4  ;;  %s636_s30 = smov [#allocation6]   ;;  %s27_s29 = int_to_ptr.hbm [resolvable:$true] %s26_s29 }
   0x3   :  { %s28_s9 = sshll.u32 %s636_s30, 4  ;;  %s39_s12 = sshll.u32 %s840_s4, 4  ;;  %s29_s9 = int_to_ptr.vmem [resolvable:$true] %s28_s9  ;;  %s40_s12 = int_to_ptr.hbm [resolvable:$true] %s39_s12 }
   0x4   :  { %s637_s13 = smov 128   ;;  %s638_s14 = smov 8  }
   0x5   :  { %34 = dma.hbm_to_vmem [thread:$0]  %s27_s29, 1024, %s29_s9, [#allocation7], %s637_s13, %s637_s13, %s638_s14  }
   0x6   :  { %s639_s15 = smov [#allocation9]  }
   0x7   :  { %s41_s16 = sshll.u32 %s639_s15, 4  ;;  %s42_s16 = int_to_ptr.vmem [resolvable:$true] %s41_s16 }
   0x8   :  { %47 = dma.hbm_to_vmem [thread:$0]  %s40_s12, 1024, %s42_s16, [#allocation10], %s637_s13, %s637_s13, %s638_s14  }
   0x9   :  { %630 = dma.done.wait [#allocation7], 1024  }
   0xa   :  { %631 = vsyncadd [#allocation7], 4294966272 }
   0xb   :  { %632 = dma.done.wait [#allocation10], 1024  }
   0xc   :  { %633 = vsyncadd [#allocation10], 4294966272  ;;  %v65_v0 = vld [vmem:[%s837_s1 + $0x8] sm:$0xff]  ;;  %v64_v2 = vld [vmem:[%s837_s1] sm:$0xff]  ;;  %vm66_vm0 = vcmask 130048   ;;  %vm96_vm1 = vcmask 64512  }
   0xd   :  { %v102_v1 = vld [vmem:[%s838_s2 + $0x8] sm:$0xff]  ;;  %87 = vmatpush.msra.mxu0 %v65_v0  ;;  %v101_v3 = vld [vmem:[%s838_s2] sm:$0xff]  ;;  %v640_v7 = vmov 0.0   ;;  %v730_v42 = vld [vmem:[#allocation6 + $0x10] sm:$0xff]  ;;  %s498_s9 = sshll.u32 %s844_s8, 4  ;;  %s499_s9 = int_to_ptr.hbm [resolvable:$true] %s498_s9 }
   0xe   :  { %123 = vmatpush.msra.mxu1 %v102_v1  ;;  %v62_v4 = vld [vmem:[%s836_s0] sm:$0xff]  ;;  %v63_v5 = vld [vmem:[%s836_s0 + $0x8] sm:$0xff]  ;;  %138 = vst.msk [vmem:[#allocation5] sm:$0xff] %vm96_vm1, %v640_v7  ;;  %v732_v43 = vld [vmem:[#allocation9 + $0x10] sm:$0xff] }
   0xf   :  { %88 = vmatpush.msra.mxu0 %v64_v2  ;;  %v134_v6 = vld [vmem:[%s841_s5] sm:$0xff]  ;;  %139 = vst.msk [vmem:[#allocation5 + $0x8] sm:$0xff] %vm96_vm1, %v640_v7  ;;  %v179_v28 = vld [vmem:[#allocation6 + $0x8] sm:$0xff] }
  0x10   :  { %124 = vmatpush.msra.mxu1 %v101_v3  ;;  %512 = vmatmul.msk.f32.vlgmr.msra.gmra.mxu0 %vm66_vm0, %v62_v4  ;;  %136 = vst.msk [vmem:[#allocation4] sm:$0xff] %vm96_vm1, %v134_v6  ;;  %v144_v10 = vld [vmem:[#allocation6] sm:$0xff]  ;;  %v181_v29 = vld [vmem:[#allocation9 + $0x8] sm:$0xff] }
  0x11   :  { %514 = vmatmul.msk.f32.vlgmr.msra.gmra.mxu1 %vm66_vm0, %v62_v4  ;;  %137 = vst.msk [vmem:[#allocation4 + $0x8] sm:$0xff] %vm96_vm1, %v134_v6  ;;  %v145_v12 = vld [vmem:[#allocation9] sm:$0xff]  ;;  %v743_v6 = vld [vmem:[#allocation9 + $0x18] sm:$0xff] }
  0x15   :  { %v162_v20 = vld [vmem:[#allocation5] sm:$0xff] }
  0x16   :  { %v163_v55 = vld [vmem:[#allocation5 + $0x8] sm:$0xff] }
  0x17   :  { %v146_v16 = vld [vmem:[#allocation4] sm:$0xff] }
  0x18   :  { %513 = vmatmul.msk.f32.gmra.mxu0 %vm66_vm0, %v63_v5  ;;  %v147_v54 = vld [vmem:[#allocation4 + $0x8] sm:$0xff] }
  0x19   :  { %515 = vmatmul.msk.f32.gmra.mxu1 %vm66_vm0, %v63_v5  ;;  %v741_v5 = vld [vmem:[#allocation6 + $0x18] sm:$0xff] }
  0x8d   :  { %v90_v8 = vpop.f32.mrf.mxu0 }
  0x8e   :  { %v126_v9 = vpop.f32.mrf.mxu1  ;;  %97 = vst.msk [vmem:[#allocation2] sm:$0xff] %vm96_vm1, %v90_v8 }
  0x8f   :  { %132 = vst.msk [vmem:[#allocation3] sm:$0xff] %vm96_vm1, %v126_v9 }
  0x95   :  { %v526_v11 = vld [vmem:[#allocation2] ss:$0 sm:$0xff]  ;;  %v93_v19 = vpop.f32.mrf.mxu0  ;;  %v527_v24 = vld [vmem:[#allocation2 + $0x1] ss:$0 sm:$0xff]  ;;  %v528_v36 = vld [vmem:[#allocation2 + $0x2] ss:$0 sm:$0xff] }
  0x96   :  { %v150_v13 = vmul.f32 %v526_v11, %v144_v10  ;;  %v164_v14 = vmul.f32 %v526_v11, %v145_v12  ;;  %v534_v15 = vld [vmem:[#allocation3] ss:$0 sm:$0xff]  ;;  %v129_v21 = vpop.f32.mrf.mxu1  ;;  %98 = vst.msk [vmem:[#allocation2 + $0x8] sm:$0xff] %vm96_vm1, %v93_v19  ;;  %v535_v27 = vld [vmem:[#allocation3 + $0x1] ss:$0 sm:$0xff]  ;;  %v186_v30 = vmul.f32 %v527_v24, %v179_v28  ;;  %v200_v32 = vmul.f32 %v527_v24, %v181_v29 }
  0x97   :  { %v154_v17 = vmul.f32 %v534_v15, %v145_v12  ;;  %v166_v18 = vmul.f32 %v534_v15, %v144_v10  ;;  %133 = vst.msk [vmem:[#allocation3 + $0x8] sm:$0xff] %vm96_vm1, %v129_v21  ;;  %v190_v31 = vmul.f32 %v535_v27, %v181_v29  ;;  %v202_v33 = vmul.f32 %v535_v27, %v179_v28  ;;  %v536_v41 = vld [vmem:[#allocation3 + $0x2] ss:$0 sm:$0xff]  ;;  %v529_v1 = vld [vmem:[#allocation2 + $0x3] ss:$0 sm:$0xff] }
  0x98   :  { %v222_v48 = vmul.f32 %v528_v36, %v730_v42  ;;  %v226_v49 = vmul.f32 %v536_v41, %v732_v43  ;;  %v236_v52 = vmul.f32 %v528_v36, %v732_v43  ;;  %v238_v53 = vmul.f32 %v536_v41, %v730_v42  ;;  %v537_v4 = vld [vmem:[#allocation3 + $0x3] ss:$0 sm:$0xff]  ;;  %v530_v27 = vld [vmem:[#allocation2 + $0x4] ss:$0 sm:$0xff] }
  0x99   :  { %v156_v22 = vsub.f32 %v150_v13, %v154_v17  ;;  %v168_v23 = vadd.f32 %v166_v18, %v164_v14  ;;  %v192_v34 = vsub.f32 %v186_v30, %v190_v31  ;;  %v204_v38 = vadd.f32 %v202_v33, %v200_v32  ;;  %v538_v30 = vld [vmem:[#allocation3 + $0x4] ss:$0 sm:$0xff]  ;;  %v753_v31 = vld [vmem:[#allocation6 + $0x20] sm:$0xff] }
  0x9a   :  { %v228_v58 = vsub.f32 %v222_v48, %v226_v49  ;;  %v240_v0 = vadd.f32 %v238_v53, %v236_v52  ;;  %v262_v13 = vmul.f32 %v537_v4, %v743_v6  ;;  %v272_v14 = vmul.f32 %v529_v1, %v743_v6  ;;  %v755_v32 = vld [vmem:[#allocation9 + $0x20] sm:$0xff] }
  0x9b   :  { %v158_v25 = vadd.f32 %v156_v22, %v146_v16  ;;  %v170_v26 = vadd.f32 %v168_v23, %v162_v20  ;;  %v274_v15 = vmul.f32 %v537_v4, %v741_v5  ;;  %v310_v41 = vmul.f32 %v538_v30, %v753_v31 }
  0x9d   :  { %160 = vst.msk [vmem:[#allocation4] sm:$0xff] %vm96_vm1, %v158_v25  ;;  %v542_v35 = vld [vmem:[#allocation2 + $0x8] ss:$0 sm:$0xff]  ;;  %v543_v59 = vld [vmem:[#allocation2 + $0x9] ss:$0 sm:$0xff]  ;;  %v276_v25 = vadd.f32 %v274_v15, %v272_v14 }
  0x9e   :  { %172 = vst.msk [vmem:[#allocation5] sm:$0xff] %vm96_vm1, %v170_v26  ;;  %v151_v45 = vmul.f32 %v542_v35, %v144_v10  ;;  %v165_v46 = vmul.f32 %v542_v35, %v145_v12  ;;  %v550_v47 = vld [vmem:[#allocation3 + $0x8] ss:$0 sm:$0xff]  ;;  %v551_v62 = vld [vmem:[#allocation3 + $0x9] ss:$0 sm:$0xff]  ;;  %v187_v8 = vmul.f32 %v543_v59, %v179_v28 }
  0x9f   :  { %v155_v50 = vmul.f32 %v550_v47, %v145_v12  ;;  %v167_v51 = vmul.f32 %v550_v47, %v144_v10  ;;  %v191_v9 = vmul.f32 %v551_v62, %v181_v29  ;;  %v201_v10 = vmul.f32 %v543_v59, %v181_v29  ;;  %v544_v20 = vld [vmem:[#allocation2 + $0xa] ss:$0 sm:$0xff]  ;;  %v552_v23 = vld [vmem:[#allocation3 + $0xa] ss:$0 sm:$0xff]  ;;  %v545_v48 = vld [vmem:[#allocation2 + $0xb] ss:$0 sm:$0xff] }
  0xa0   :  { %v203_v11 = vmul.f32 %v551_v62, %v179_v28  ;;  %v258_v12 = vmul.f32 %v529_v1, %v741_v5  ;;  %v227_v35 = vmul.f32 %v552_v23, %v732_v43  ;;  %v237_v36 = vmul.f32 %v544_v20, %v732_v43 }
  0xa1   :  { %v157_v56 = vsub.f32 %v151_v45, %v155_v50  ;;  %v169_v57 = vadd.f32 %v167_v51, %v165_v46  ;;  %v193_v16 = vsub.f32 %v187_v8, %v191_v9  ;;  %v553_v51 = vld [vmem:[#allocation3 + $0xb] ss:$0 sm:$0xff]  ;;  %v273_v62 = vmul.f32 %v545_v48, %v743_v6 }
  0xa2   :  { %v205_v18 = vadd.f32 %v203_v11, %v201_v10  ;;  %v264_v19 = vsub.f32 %v258_v12, %v262_v13  ;;  %v546_v10 = vld [vmem:[#allocation2 + $0xc] ss:$0 sm:$0xff]  ;;  %v554_v13 = vld [vmem:[#allocation3 + $0xc] ss:$0 sm:$0xff] }
  0xa3   :  { %v159_v60 = vadd.f32 %v157_v56, %v147_v54  ;;  %v171_v61 = vadd.f32 %v169_v57, %v163_v55  ;;  %v539_v56 = vld [vmem:[#allocation3 + $0x5] ss:$0 sm:$0xff]  ;;  %v769_v57 = vld [vmem:[#allocation6 + $0x28] sm:$0xff] }
  0xa4   :  { %v182_v37 = vld [vmem:[#allocation4] sm:$0xff] }
  0xa5   :  { %v194_v39 = vadd.f32 %v192_v34, %v182_v37  ;;  %v198_v40 = vld [vmem:[#allocation5] sm:$0xff]  ;;  %161 = vst.msk [vmem:[#allocation4 + $0x8] sm:$0xff] %vm96_vm1, %v159_v60  ;;  %v223_v34 = vmul.f32 %v544_v20, %v730_v42  ;;  %v239_v37 = vmul.f32 %v552_v23, %v730_v42  ;;  %v531_v42 = vld [vmem:[#allocation2 + $0x5] ss:$0 sm:$0xff]  ;;  %v259_v60 = vmul.f32 %v545_v48, %v741_v5 }
  0xa6   :  { %v206_v44 = vadd.f32 %v204_v38, %v198_v40  ;;  %173 = vst.msk [vmem:[#allocation5 + $0x8] sm:$0xff] %vm96_vm1, %v171_v61  ;;  %v294_v38 = vmul.f32 %v530_v27, %v753_v31  ;;  %v308_v40 = vmul.f32 %v530_v27, %v755_v32  ;;  %v263_v61 = vmul.f32 %v553_v51, %v743_v6  ;;  %v787_v20 = vld [vmem:[#allocation9 + $0x30] sm:$0xff] }
  0xa7   :  { %196 = vst.msk [vmem:[#allocation4] sm:$0xff] %vm96_vm1, %v194_v39  ;;  %v298_v39 = vmul.f32 %v538_v30, %v755_v32  ;;  %v241_v46 = vadd.f32 %v239_v37, %v237_v36  ;;  %v299_v23 = vmul.f32 %v554_v13, %v755_v32  ;;  %v547_v36 = vld [vmem:[#allocation2 + $0xd] ss:$0 sm:$0xff]  ;;  %v541_v48 = vld [vmem:[#allocation3 + $0x7] ss:$0 sm:$0xff] }
  0xa8   :  { %208 = vst.msk [vmem:[#allocation5] sm:$0xff] %vm96_vm1, %v206_v44  ;;  %v229_v44 = vsub.f32 %v223_v34, %v227_v35  ;;  %v312_v43 = vadd.f32 %v310_v41, %v308_v40  ;;  %v265_v4 = vsub.f32 %v259_v60, %v263_v61 }
  0xa9   :  { %v300_v47 = vsub.f32 %v294_v38, %v298_v39  ;;  %v555_v39 = vld [vmem:[#allocation3 + $0xd] ss:$0 sm:$0xff] }
  0xac   :  { %v183_v17 = vld [vmem:[#allocation4 + $0x8] sm:$0xff] }
  0xad   :  { %v195_v21 = vadd.f32 %v193_v16, %v183_v17  ;;  %v199_v22 = vld [vmem:[#allocation5 + $0x8] sm:$0xff] }
  0xae   :  { %v218_v63 = vld [vmem:[#allocation4] sm:$0xff]  ;;  %v207_v26 = vadd.f32 %v205_v18, %v199_v22  ;;  %v540_v18 = vld [vmem:[#allocation3 + $0x6] ss:$0 sm:$0xff]  ;;  %v295_v22 = vmul.f32 %v546_v10, %v753_v31 }
  0xaf   :  { %v230_v2 = vadd.f32 %v228_v58, %v218_v63  ;;  %v234_v3 = vld [vmem:[#allocation5] sm:$0xff]  ;;  %197 = vst.msk [vmem:[#allocation4 + $0x8] sm:$0xff] %vm96_vm1, %v195_v21  ;;  %v771_v58 = vld [vmem:[#allocation9 + $0x28] sm:$0xff]  ;;  %v275_v63 = vmul.f32 %v553_v51, %v741_v5  ;;  %v532_v5 = vld [vmem:[#allocation2 + $0x6] ss:$0 sm:$0xff]  ;;  %v370_v27 = vmul.f32 %v540_v18, %v787_v20 }
  0xb0   :  { %v242_v7 = vadd.f32 %v240_v0, %v234_v3  ;;  %209 = vst.msk [vmem:[#allocation5 + $0x8] sm:$0xff] %vm96_vm1, %v207_v26  ;;  %v330_v0 = vmul.f32 %v531_v42, %v769_v57  ;;  %v334_v1 = vmul.f32 %v539_v56, %v771_v58  ;;  %v346_v3 = vmul.f32 %v539_v56, %v769_v57 }
  0xb1   :  { %232 = vst.msk [vmem:[#allocation4] sm:$0xff] %vm96_vm1, %v230_v2  ;;  %v344_v2 = vmul.f32 %v531_v42, %v771_v58  ;;  %v277_v8 = vadd.f32 %v275_v63, %v273_v62  ;;  %v301_v30 = vsub.f32 %v295_v22, %v299_v23  ;;  %v347_v42 = vmul.f32 %v555_v39, %v769_v57 }
  0xb2   :  { %244 = vst.msk [vmem:[#allocation5] sm:$0xff] %vm96_vm1, %v242_v7  ;;  %v336_v9 = vsub.f32 %v330_v0, %v334_v1  ;;  %v548_v0 = vld [vmem:[#allocation2 + $0xe] ss:$0 sm:$0xff] }
  0xb3   :  { %v348_v6 = vadd.f32 %v346_v3, %v344_v2  ;;  %v556_v3 = vld [vmem:[#allocation3 + $0xe] ss:$0 sm:$0xff] }
  0xb6   :  { %v219_v45 = vld [vmem:[#allocation4 + $0x8] sm:$0xff] }
  0xb7   :  { %v231_v49 = vadd.f32 %v229_v44, %v219_v45  ;;  %v235_v50 = vld [vmem:[#allocation5 + $0x8] sm:$0xff]  ;;  %v428_v44 = vld [vmem:[%s842_s6] sm:$0xff]  ;;  %s641_s6 = smov [#allocation11]  }
  0xb8   :  { %v254_v24 = vld [vmem:[#allocation4] sm:$0xff]  ;;  %v243_v53 = vadd.f32 %v241_v46, %v235_v50  ;;  %482 = vmatpush.msra.mxu3 %v428_v44  ;;  %v397_v50 = vld [vmem:[#allocation9 + $0x38] sm:$0xff] }
  0xb9   :  { %v266_v28 = vadd.f32 %v264_v19, %v254_v24  ;;  %v270_v29 = vld [vmem:[#allocation5] sm:$0xff]  ;;  %233 = vst.msk [vmem:[#allocation4 + $0x8] sm:$0xff] %vm96_vm1, %v231_v49  ;;  %v309_v24 = vmul.f32 %v546_v10, %v755_v32  ;;  %v533_v45 = vld [vmem:[#allocation2 + $0x7] ss:$0 sm:$0xff]  ;;  %v395_v49 = vld [vmem:[#allocation6 + $0x38] sm:$0xff] }
  0xba   :  { %v278_v33 = vadd.f32 %v276_v25, %v270_v29  ;;  %245 = vst.msk [vmem:[#allocation5 + $0x8] sm:$0xff] %vm96_vm1, %v243_v53  ;;  %v785_v19 = vld [vmem:[#allocation6 + $0x30] sm:$0xff]  ;;  %v311_v25 = vmul.f32 %v554_v13, %v753_v31  ;;  %v431_v31 = vld [vmem:[%s843_s7] sm:$0xff]  ;;  %v345_v53 = vmul.f32 %v547_v36, %v771_v58  ;;  %v416_v56 = vmul.f32 %v533_v45, %v397_v50  ;;  %s496_s7 = sshll.u32 %s641_s6, 4  ;;  %s497_s7 = int_to_ptr.vmem [resolvable:$true] %s496_s7 }
  0xbb   :  { %268 = vst.msk [vmem:[#allocation4] sm:$0xff] %vm96_vm1, %v266_v28  ;;  %v366_v26 = vmul.f32 %v532_v5, %v785_v19  ;;  %v380_v28 = vmul.f32 %v532_v5, %v787_v20  ;;  %v382_v29 = vmul.f32 %v540_v18, %v785_v19  ;;  %453 = vmatpush.msra.mxu2 %v431_v31  ;;  %v549_v5 = vld [vmem:[#allocation2 + $0xf] ss:$0 sm:$0xff]  ;;  %v557_v18 = vld [vmem:[#allocation3 + $0xf] ss:$0 sm:$0xff] }
  0xbc   :  { %280 = vst.msk [vmem:[#allocation5] sm:$0xff] %vm96_vm1, %v278_v33  ;;  %v313_v34 = vadd.f32 %v311_v25, %v309_v24  ;;  %v349_v62 = vadd.f32 %v347_v42, %v345_v53  ;;  %v383_v13 = vmul.f32 %v556_v3, %v785_v19  ;;  %v417_v24 = vmul.f32 %v549_v5, %v397_v50 }
  0xbd   :  { %v372_v35 = vsub.f32 %v366_v26, %v370_v27  ;;  %v384_v32 = vadd.f32 %v382_v29, %v380_v28  ;;  %v419_v25 = vmul.f32 %v557_v18, %v395_v49 }
  0xbf   :  { %v421_v28 = vadd.f32 %v419_v25, %v417_v24 }
  0xc0   :  { %v255_v7 = vld [vmem:[#allocation4 + $0x8] sm:$0xff] }
  0xc1   :  { %v267_v11 = vadd.f32 %v265_v4, %v255_v7  ;;  %v271_v12 = vld [vmem:[#allocation5 + $0x8] sm:$0xff] }
  0xc2   :  { %v290_v52 = vld [vmem:[#allocation4] sm:$0xff]  ;;  %v279_v15 = vadd.f32 %v277_v8, %v271_v12  ;;  %v381_v12 = vmul.f32 %v548_v0, %v787_v20 }
  0xc3   :  { %v302_v54 = vadd.f32 %v300_v47, %v290_v52  ;;  %v306_v55 = vld [vmem:[#allocation5] sm:$0xff]  ;;  %269 = vst.msk [vmem:[#allocation4 + $0x8] sm:$0xff] %vm96_vm1, %v267_v11  ;;  %v331_v52 = vmul.f32 %v547_v36, %v769_v57  ;;  %v371_v11 = vmul.f32 %v556_v3, %v787_v20  ;;  %v403_v20 = vmul.f32 %v549_v5, %v395_v49 }
  0xc4   :  { %v314_v59 = vadd.f32 %v312_v43, %v306_v55  ;;  %281 = vst.msk [vmem:[#allocation5 + $0x8] sm:$0xff] %vm96_vm1, %v279_v15  ;;  %v335_v43 = vmul.f32 %v555_v39, %v771_v58  ;;  %v406_v55 = vmul.f32 %v541_v48, %v397_v50  ;;  %v367_v58 = vmul.f32 %v548_v0, %v785_v19 }
  0xc5   :  { %304 = vst.msk [vmem:[#allocation4] sm:$0xff] %vm96_vm1, %v302_v54  ;;  %v402_v54 = vmul.f32 %v533_v45, %v395_v49  ;;  %v385_v15 = vadd.f32 %v383_v13, %v381_v12  ;;  %v407_v19 = vmul.f32 %v557_v18, %v397_v50 }
  0xc6   :  { %316 = vst.msk [vmem:[#allocation5] sm:$0xff] %vm96_vm1, %v314_v59  ;;  %v418_v59 = vmul.f32 %v541_v48, %v395_v49  ;;  %v337_v60 = vsub.f32 %v331_v52, %v335_v43 }
  0xc7   :  { %v408_v63 = vsub.f32 %v402_v54, %v406_v55  ;;  %v409_v26 = vsub.f32 %v403_v20, %v407_v19 }
  0xc8   :  { %v420_v7 = vadd.f32 %v418_v59, %v416_v56 }
  0xca   :  { %v291_v33 = vld [vmem:[#allocation4 + $0x8] sm:$0xff] }
  0xcb   :  { %v303_v37 = vadd.f32 %v301_v30, %v291_v33  ;;  %v307_v38 = vld [vmem:[#allocation5 + $0x8] sm:$0xff] }
  0xcc   :  { %v326_v14 = vld [vmem:[#allocation4] sm:$0xff]  ;;  %v315_v41 = vadd.f32 %v313_v34, %v307_v38 }
  0xcd   :  { %v338_v16 = vadd.f32 %v336_v9, %v326_v14  ;;  %v342_v17 = vld [vmem:[#allocation5] sm:$0xff]  ;;  %305 = vst.msk [vmem:[#allocation4 + $0x8] sm:$0xff] %vm96_vm1, %v303_v37  ;;  %v373_v14 = vsub.f32 %v367_v58, %v371_v11 }
  0xce   :  { %v350_v21 = vadd.f32 %v348_v6, %v342_v17  ;;  %317 = vst.msk [vmem:[#allocation5 + $0x8] sm:$0xff] %vm96_vm1, %v315_v41 }
  0xcf   :  { %340 = vst.msk [vmem:[#allocation4] sm:$0xff] %vm96_vm1, %v338_v16 }
  0xd0   :  { %352 = vst.msk [vmem:[#allocation5] sm:$0xff] %vm96_vm1, %v350_v21 }
  0xd4   :  { %v327_v61 = vld [vmem:[#allocation4 + $0x8] sm:$0xff] }
  0xd5   :  { %v339_v1 = vadd.f32 %v337_v60, %v327_v61  ;;  %v343_v2 = vld [vmem:[#allocation5 + $0x8] sm:$0xff] }
  0xd6   :  { %v362_v40 = vld [vmem:[#allocation4] sm:$0xff]  ;;  %v351_v8 = vadd.f32 %v349_v62, %v343_v2 }
  0xd7   :  { %v374_v46 = vadd.f32 %v372_v35, %v362_v40  ;;  %v378_v47 = vld [vmem:[#allocation5] sm:$0xff]  ;;  %341 = vst.msk [vmem:[#allocation4 + $0x8] sm:$0xff] %vm96_vm1, %v339_v1 }
  0xd8   :  { %v386_v51 = vadd.f32 %v384_v32, %v378_v47  ;;  %353 = vst.msk [vmem:[#allocation5 + $0x8] sm:$0xff] %vm96_vm1, %v351_v8 }
  0xd9   :  { %376 = vst.msk [vmem:[#allocation4] sm:$0xff] %vm96_vm1, %v374_v46 }
  0xda   :  { %388 = vst.msk [vmem:[#allocation5] sm:$0xff] %vm96_vm1, %v386_v51 }
  0xde   :  { %v363_v6 = vld [vmem:[#allocation4 + $0x8] sm:$0xff] }
  0xdf   :  { %v375_v16 = vadd.f32 %v373_v14, %v363_v6  ;;  %v379_v17 = vld [vmem:[#allocation5 + $0x8] sm:$0xff] }
  0xe0   :  { %v398_v4 = vld [vmem:[#allocation4] sm:$0xff]  ;;  %v387_v21 = vadd.f32 %v385_v15, %v379_v17 }
  0xe1   :  { %v410_v9 = vadd.f32 %v408_v63, %v398_v4  ;;  %v414_v10 = vld [vmem:[#allocation5] sm:$0xff]  ;;  %377 = vst.msk [vmem:[#allocation4 + $0x8] sm:$0xff] %vm96_vm1, %v375_v16 }
  0xe2   :  { %v422_v57 = vadd.f32 %v420_v7, %v414_v10  ;;  %389 = vst.msk [vmem:[#allocation5 + $0x8] sm:$0xff] %vm96_vm1, %v387_v21 }
  0xe3   :  { %412 = vst.msk [vmem:[#allocation4] sm:$0xff] %vm96_vm1, %v410_v9 }
  0xe4   :  { %424 = vst.msk [vmem:[#allocation5] sm:$0xff] %vm96_vm1, %v422_v57 }
  0xe8   :  { %v399_v27 = vld [vmem:[#allocation4 + $0x8] sm:$0xff] }
  0xe9   :  { %v411_v29 = vadd.f32 %v409_v26, %v399_v27  ;;  %v415_v30 = vld [vmem:[#allocation5 + $0x8] sm:$0xff] }
  0xea   :  { %v426_v22 = vld [vmem:[#allocation4] sm:$0xff]  ;;  %v423_v33 = vadd.f32 %v421_v28, %v415_v30 }
  0xeb   :  { %v429_v23 = vld [vmem:[#allocation5] sm:$0xff]  ;;  %518 = vmatmul.msk.f32.vlgmr.msra.gmra.mxu3 %vm96_vm1, %v426_v22  ;;  %413 = vst.msk [vmem:[#allocation4 + $0x8] sm:$0xff] %vm96_vm1, %v411_v29 }
  0xec   :  { %516 = vmatmul.msk.f32.vlgmr.msra.gmra.mxu2 %vm96_vm1, %v429_v23  ;;  %425 = vst.msk [vmem:[#allocation5 + $0x8] sm:$0xff] %vm96_vm1, %v423_v33 }
  0xf2   :  { %v427_v34 = vld [vmem:[#allocation4 + $0x8] sm:$0xff] }
  0xf3   :  { %v430_v35 = vld [vmem:[#allocation5 + $0x8] sm:$0xff]  ;;  %519 = vmatmul.msk.f32.gmra.mxu3 %vm96_vm1, %v427_v34 }
  0xf4   :  { %517 = vmatmul.msk.f32.gmra.mxu2 %vm96_vm1, %v430_v35 }
 0x16e   :  { %v484_v36 = vpop.f32.mrf.mxu3 }
 0x16f   :  { %v455_v37 = vpop.f32.mrf.mxu2 }
 0x170   :  { %v485_v38 = vadd.f32 %v484_v36, %v455_v37 }
 0x172   :  { %490 = vst [vmem:[#allocation11] sm:$0xff] %v485_v38 }
 0x176   :  { %v487_v39 = vpop.f32.mrf.mxu3 }
 0x177   :  { %v458_v40 = vpop.f32.mrf.mxu2 }
 0x178   :  { %v488_v32 = vadd.f32 %v487_v39, %v458_v40 }
 0x17a   :  { %491 = vst [vmem:[#allocation11 + $0x8] sm:$0xff] %v488_v32 }
 0x17b   :  { %504 = dma.vmem_to_hbm [thread:$0]  %s497_s7, 256, %s499_s9, [#allocation8], %s637_s13, %s637_s13, %s638_s14  }
 0x17c   :  { %634 = dma.done.wait [#allocation8], 256  }
 0x17d   :  { %635 = vsyncadd [#allocation8], 4294967040 }
 0x17e   :  { %509 = vsyncpa [#allocation7], 1 }
 0x17f   :  { %510 = vsyncpa [#allocation10], 1 }
 0x180   :  { %511 = vsyncpa [#allocation8], 1 }

</bundles_post_ra>
